<compile_context>
chip_gen: v5e
topology: v5e:2x2
jax: 0.10.0
libtpu: 0.0.40
codegen_flags: <defaults>
</compile_context>

<pallas_src>
import jax
import jax.numpy as jnp
from jax.experimental import pallas as pl
from jax.experimental.pallas import tpu as pltpu


def _softplus(x):
    # Stable log(1 + exp(x)) == torch.log(1 + torch.exp(x)); avoids log1p so the
    # kernel only needs exp/log (guaranteed Mosaic lowerings).
    return jnp.maximum(x, 0.0) + jnp.log(1.0 + jnp.exp(-jnp.abs(x)))


def _round_up(x, m):
    return ((x + m - 1) // m) * m


# ---------- portable on-chip standard-normal generator ----------------------
def _mix32(x):
    # splitmix32-style avalanche (lowbias32 constants), uint32 wraparound math.
    x = x ^ (x >> 16)
    x = x * jnp.uint32(0x7FEB352D)
    x = x ^ (x >> 15)
    x = x * jnp.uint32(0x846CA68B)
    x = x ^ (x >> 16)
    return x


def _std_normal(counter_i32, seed_i32):
    """Counter-based N(0,1): hash(global index ^ seed) -> uniform -> Phi^-1."""
    bits = _mix32((counter_i32 ^ seed_i32).astype(jnp.uint32))
    # Top 24 bits -> uniform in (0, 1), exact in f32 (int32 path avoids uitofp).
    u = (bits >> 8).astype(jnp.int32).astype(jnp.float32) * (2.0 ** -24) + (2.0 ** -25)
    # Inverse normal CDF, Abramowitz & Stegun 26.2.23 (|err| < 4.5e-4); only
    # log/sqrt/arith, so it runs on the EUP and in interpret mode alike.
    p = jnp.minimum(u, 1.0 - u)
    t = jnp.sqrt(-2.0 * jnp.log(p))
    num = 2.515517 + t * (0.802853 + t * 0.010328)
    den = 1.0 + t * (1.432788 + t * (0.189269 + t * 0.001308))
    z = t - num / den
    return jnp.where(u < 0.5, -z, z)


# ---------- kernel -----------------------------------------------------------
def _make_kernel(*, training, return_samples, matmul_dtype, bn, bk, k_total):
    def kernel(*refs):
        if training:
            seed_ref, x_ref, wmu_ref, wrho_ref, bmu_ref, brho_ref = refs[:6]
            rest = refs[6:]
        else:
            seed_ref, x_ref, wmu_ref, bmu_ref = refs[:4]
            wrho_ref = brho_ref = None
            rest = refs[4:]
        if return_samples:
            o_ref, ws_ref, bs_ref, acc_ref = rest
        else:
            o_ref, acc_ref = rest
            ws_ref = bs_ref = None

        j = pl.program_id(1)          # N (out_features) tile index
        k = pl.program_id(2)          # K (in_features) reduction tile index
        nk = pl.num_programs(2)

        @pl.when(k == 0)
        def _init():
            acc_ref[...] = jnp.zeros_like(acc_ref)

        if training:
            # eps depends only on the global (row, col) element index + seed ->
            # identical for every batch tile; never streamed from HBM.
            row = jax.lax.broadcasted_iota(jnp.int32, (bn, bk), 0) + j * bn
            col = jax.lax.broadcasted_iota(jnp.int32, (bn, bk), 1) + k * bk
            counter = row * k_total + col           # wraps for huge layers; ok for hashing
            w_eps = _std_normal(counter, seed_ref[0])
            w = (wmu_ref[...].astype(jnp.float32)
                 + _softplus(wrho_ref[...].astype(jnp.float32)) * w_eps)
        else:
            w = wmu_ref[...].astype(jnp.float32)

        if return_samples:
            ws_ref[...] = w.astype(ws_ref.dtype)

        # x:(bm,bk) contracted with w:(bn,bk) over K -> (bm,bn); no transpose,
        # f32 accumulation on the MXU regardless of operand dtype.
        acc_ref[...] += jax.lax.dot_general(
            x_ref[...].astype(matmul_dtype),
            w.astype(matmul_dtype),
            dimension_numbers=(((1,), (1,)), ((), ())),
            preferred_element_type=jnp.float32,
        )

        @pl.when(k == nk - 1)
        def _finalize():
            b_mu = bmu_ref[...].astype(jnp.float32)
            if training:
                bcol = jax.lax.broadcasted_iota(jnp.int32, bmu_ref.shape, 1) + j * bn
                b_eps = _std_normal(bcol, seed_ref[1])   # separate seed stream
                b = b_mu + _softplus(brho_ref[...].astype(jnp.float32)) * b_eps
            else:
                b = b_mu
            if return_samples:
                bs_ref[...] = b.astype(bs_ref.dtype)
            o_ref[...] = (acc_ref[...] + b).astype(o_ref.dtype)

    return kernel


# ---------- wrapper ----------------------------------------------------------
def _pad2(a, rows, cols):
    r, c = a.shape
    if r == rows and c == cols:
        return a                                    # no extra HBM pass when aligned
    return jnp.pad(a, ((0, rows - r), (0, cols - c)))


def bayesian_linear_forward(x, weight_mu, weight_rho, bias_mu, bias_rho, *,
                            training=True, eps_key=None, return_samples=False,
                            matmul_dtype=jnp.float32, param_dtype=None,
                            bm=None, bn=None, bk=None,
                            vmem_limit_bytes=48 * 1024 * 1024):
    """Pallas forward for BayesianLinear. x: (B, in), weights: (out, in).

    matmul_dtype=jnp.bfloat16 is the recommended MXU path on v6e/v7x;
    param_dtype=jnp.bfloat16 halves mu/rho HBM streaming (kernel math stays f32).
    """
    out_features, in_features = weight_mu.shape
    batch = x.shape[0]

    if param_dtype is not None:
        weight_mu = weight_mu.astype(param_dtype)
        weight_rho = weight_rho.astype(param_dtype)
        bias_mu = bias_mu.astype(param_dtype)
        bias_rho = bias_rho.astype(param_dtype)

    # Tile sizes: bm multiple of 8 (sublane), bn/bk multiples of 128 (lane).
    if bm is None:
        bm = min(_round_up(batch, 8), 256)          # one M tile for typical batches
    if bk is None:
        bk = min(_round_up(in_features, 128), 1024)
    if bn is None:
        bn = min(_round_up(out_features, 128), 512)
        n_pad = _round_up(out_features, 128)
        if return_samples and n_pad >= 256:
            # batch axis is "arbitrary" on this path -> keep >=2 j tiles so both
            # v7x TensorCores still get independent work.
            bn = min(bn, max(128, (n_pad // 2) // 128 * 128))

    M = _round_up(batch, bm)
    N = _round_up(out_features, bn)
    K = _round_up(in_features, bk)
    grid = (M // bm, N // bn, K // bk)

    if training:
        assert eps_key is not None, "training mode needs an eps_key"
        seeds = jax.random.randint(eps_key, (2,), 0, jnp.iinfo(jnp.int32).max,
                                   dtype=jnp.int32)
    else:
        seeds = jnp.zeros((2,), jnp.int32)          # unused in eval mode

    x_p = _pad2(x, M, K)
    wmu_p = _pad2(weight_mu, N, K)
    bmu_p = _pad2(bias_mu.reshape(1, -1), 1, N)

    inputs = [x_p, wmu_p]
    in_specs = [
        pl.BlockSpec((bm, bk), lambda i, j, k, *_: (i, k)),    # x
        pl.BlockSpec((bn, bk), lambda i, j, k, *_: (j, k)),    # weight_mu
    ]
    if training:
        inputs.append(_pad2(weight_rho, N, K))                 # weight_rho
        in_specs.append(pl.BlockSpec((bn, bk), lambda i, j, k, *_: (j, k)))
    inputs.append(bmu_p)                                       # bias_mu
    in_specs.append(pl.BlockSpec((1, bn), lambda i, j, k, *_: (0, j)))
    if training:
        inputs.append(_pad2(bias_rho.reshape(1, -1), 1, N))    # bias_rho
        in_specs.append(pl.BlockSpec((1, bn), lambda i, j, k, *_: (0, j)))

    out_shape = [jax.ShapeDtypeStruct((M, N), x.dtype)]
    out_specs = [pl.BlockSpec((bm, bn), lambda i, j, k, *_: (i, j))]
    if return_samples:
        out_shape += [jax.ShapeDtypeStruct((N, K), jnp.float32),
                      jax.ShapeDtypeStruct((1, N), jnp.float32)]
        out_specs += [pl.BlockSpec((bn, bk), lambda i, j, k, *_: (j, k)),
                      pl.BlockSpec((1, bn), lambda i, j, k, *_: (0, j))]

    # Sample outputs ignore the batch axis -> demote it so two cores never write
    # the same block; otherwise let megacore split batch x N.
    batch_sem = "arbitrary" if return_samples else "parallel"
    compiler_params = pltpu.CompilerParams(
        dimension_semantics=(batch_sem, "parallel", "arbitrary"),
        vmem_limit_bytes=vmem_limit_bytes,
    )

    kernel = _make_kernel(training=training, return_samples=return_samples,
                          matmul_dtype=matmul_dtype, bn=bn, bk=bk, k_total=K)

    results = pl.pallas_call(
        kernel,
        out_shape=out_shape,
        grid_spec=pltpu.PrefetchScalarGridSpec(
            num_scalar_prefetch=1,
            grid=grid,
            in_specs=in_specs,
            out_specs=out_specs,
            scratch_shapes=[pltpu.VMEM((bm, bn), jnp.float32)],
        ),
        compiler_params=compiler_params,
    )(seeds, *inputs)

    y = results[0][:batch, :out_features]
    if return_samples:
        w_sample = results[1][:out_features, :in_features]
        b_sample = results[2][0, :out_features]
        return y, w_sample, b_sample
    return y


def init_bayesian_linear_params(key, in_features, out_features):
    """Deterministic init matching the PyTorch __init__."""
    k1, k2, k3, k4 = jax.random.split(key, 4)
    xavier_std = (2.0 / (in_features + out_features)) ** 0.5
    weight_mu = xavier_std * jax.random.normal(k1, (out_features, in_features), jnp.float32)
    weight_rho = jax.random.uniform(k2, (out_features, in_features), jnp.float32,
                                    minval=-5.0, maxval=-4.0)
    bias_mu = jax.random.uniform(k3, (out_features,), jnp.float32,
                                 minval=-0.1, maxval=0.1)
    bias_rho = jax.random.uniform(k4, (out_features,), jnp.float32,
                                  minval=-5.0, maxval=-4.0)
    return weight_mu, weight_rho, bias_mu, bias_rho


if __name__ == "__main__":
    key = jax.random.PRNGKey(0)
    k_param, k_x, k_eps = jax.random.split(key, 3)

    batch, in_features, out_features = 8, 32, 64

    weight_mu, weight_rho, bias_mu, bias_rho = init_bayesian_linear_params(
        k_param, in_features, out_features)
    x = jax.random.normal(k_x, (batch, in_features), jnp.float32)

    hp = jax.lax.Precision.HIGHEST

    # ---- training mode: eps drawn on-chip; sampled weight/bias returned
    # (PyTorch's self.weight_sample / self.bias_sample) and used to verify the
    # fused softplus + matmul + bias path exactly.
    y, w_s, b_s = bayesian_linear_forward(
        x, weight_mu, weight_rho, bias_mu, bias_rho,
        training=True, eps_key=k_eps, return_samples=True)
    y, w_s, b_s = jax.block_until_ready((y, w_s, b_s))
    assert y.shape == (batch, out_features)

    y_train_ref = jnp.dot(x, w_s.T, precision=hp) + b_s
    assert jnp.allclose(y, y_train_ref, atol=1e-4, rtol=1e-4), "train-mode linear mismatch"

    # Sampled weight must equal mu + softplus(rho) * N(0,1): loose, non-flaky
    # sanity bounds on the implied standard-normal draws.
    z = (w_s - weight_mu) / _softplus(weight_rho)
    assert bool(jnp.all(jnp.isfinite(z)))
    assert float(jnp.max(jnp.abs(z))) < 12.0
    assert 0.7 < float(jnp.std(z)) < 1.3

    # ---- eval mode: deterministic linear.
    y_eval = bayesian_linear_forward(
        x, weight_mu, weight_rho, bias_mu, bias_rho, training=False)
    y_eval = jax.block_until_ready(y_eval)
    y_eval_ref = jnp.dot(x, weight_mu.T, precision=hp) + bias_mu
    assert jnp.allclose(y_eval, y_eval_ref, atol=1e-4, rtol=1e-4), "eval-mode mismatch"

    # ---- bf16 streaming + bf16 MXU operands (v6e/v7x fast path), loose tol.
    y_bf16 = bayesian_linear_forward(
        x, weight_mu, weight_rho, bias_mu, bias_rho, training=False,
        matmul_dtype=jnp.bfloat16, param_dtype=jnp.bfloat16)
    y_bf16 = jax.block_until_ready(y_bf16)
    assert jnp.allclose(y_bf16, y_eval_ref, atol=5e-2, rtol=5e-2), "bf16 path mismatch"

    print("KERNEL_OK")
</pallas_src>

<mosaic_0001>
module attributes {stable_mosaic.version = 11 : i64} {
  func.func @kernel(%arg0: i32, %arg1: i32, %arg2: i32, %arg3: memref<2xi32, #tpu.memory_space<smem>>, %arg4: memref<8x128xf32, #tpu.memory_space<vmem>>, %arg5: memref<128x128xf32, #tpu.memory_space<vmem>>, %arg6: memref<128x128xf32, #tpu.memory_space<vmem>>, %arg7: memref<1x128xf32, #tpu.memory_space<vmem>>, %arg8: memref<1x128xf32, #tpu.memory_space<vmem>>, %arg9: memref<8x128xf32, #tpu.memory_space<vmem>>, %arg10: memref<128x128xf32, #tpu.memory_space<vmem>>, %arg11: memref<1x128xf32, #tpu.memory_space<vmem>>, %arg12: memref<8x128xf32, #tpu.memory_space<vmem>>) attributes {dimension_semantics = [#tpu.dimension_semantics<arbitrary>, #tpu.dimension_semantics<parallel>, #tpu.dimension_semantics<arbitrary>], iteration_bounds = array<i64: 1, 1, 1>, scalar_prefetch = 1 : i64, scratch_operands = 1 : i64, tpu.core_type = #tpu.core_type<tc>, window_params = [{transform_indices = @transform_0, window_bounds = array<i64: 8, 128>}, {transform_indices = @transform_1, window_bounds = array<i64: 128, 128>}, {transform_indices = @transform_2, window_bounds = array<i64: 128, 128>}, {transform_indices = @transform_3, window_bounds = array<i64: 1, 128>}, {transform_indices = @transform_4, window_bounds = array<i64: 1, 128>}, {transform_indices = @transform_5, window_bounds = array<i64: 8, 128>}, {transform_indices = @transform_6, window_bounds = array<i64: 128, 128>}, {transform_indices = @transform_7, window_bounds = array<i64: 1, 128>}]} {
    %c0_i32 = arith.constant 0 : i32
    %0 = arith.cmpi eq, %arg2, %c0_i32 : i32
    %1 = arith.extui %0 : i1 to i32
    %c0_i32_0 = arith.constant 0 : i32
    %2 = arith.cmpi ne, %1, %c0_i32_0 : i32
    scf.if %2 {
      %cst_34 = arith.constant 0.000000e+00 : f32
      %91 = vector.broadcast %cst_34 : f32 to vector<8x128xf32>
      %c0_35 = arith.constant 0 : index
      %c0_36 = arith.constant 0 : index
      %92 = vector.load %arg12[%c0_35, %c0_36] : memref<8x128xf32, #tpu.memory_space<vmem>>, vector<8x128xf32>
      tpu.vector_store %arg12[%c0_35, %c0_36], %91 {strides = array<i32>} : memref<8x128xf32, #tpu.memory_space<vmem>>, vector<8x128xf32>,
    } else {
    }
    %3 = tpu.iota {dimensions = array<i32: 0>} : vector<128x128xi32>
    %c128_i32 = arith.constant 128 : i32
    %4 = arith.muli %arg1, %c128_i32 : i32
    %5 = vector.broadcast %4 : i32 to vector<128x128xi32>
    %6 = arith.addi %3, %5 : vector<128x128xi32>
    %7 = tpu.iota {dimensions = array<i32: 1>} : vector<128x128xi32>
    %c128_i32_1 = arith.constant 128 : i32
    %8 = arith.muli %arg2, %c128_i32_1 : i32
    %9 = vector.broadcast %8 : i32 to vector<128x128xi32>
    %10 = arith.addi %7, %9 : vector<128x128xi32>
    %c128_i32_2 = arith.constant 128 : i32
    %11 = vector.broadcast %c128_i32_2 : i32 to vector<128x128xi32>
    %12 = arith.muli %6, %11 : vector<128x128xi32>
    %13 = arith.addi %12, %10 : vector<128x128xi32>
    %c0 = arith.constant 0 : index
    %14 = memref.load %arg3[%c0] : memref<2xi32, #tpu.memory_space<smem>>
    %15 = vector.broadcast %14 : i32 to vector<128x128xi32>
    %16 = arith.xori %13, %15 : vector<128x128xi32>
    %c16_i32 = arith.constant 16 : i32
    %17 = vector.broadcast %c16_i32 : i32 to vector<128x128xi32>
    %18 = arith.shrui %16, %17 : vector<128x128xi32>
    %19 = arith.xori %16, %18 : vector<128x128xi32>
    %c2146121005_i32 = arith.constant 2146121005 : i32
    %20 = vector.broadcast %c2146121005_i32 : i32 to vector<128x128xi32>
    %21 = arith.muli %19, %20 : vector<128x128xi32>
    %c15_i32 = arith.constant 15 : i32
    %22 = vector.broadcast %c15_i32 : i32 to vector<128x128xi32>
    %23 = arith.shrui %21, %22 : vector<128x128xi32>
    %24 = arith.xori %21, %23 : vector<128x128xi32>
    %c-2073254261_i32 = arith.constant -2073254261 : i32
    %25 = vector.broadcast %c-2073254261_i32 : i32 to vector<128x128xi32>
    %26 = arith.muli %24, %25 : vector<128x128xi32>
    %c16_i32_3 = arith.constant 16 : i32
    %27 = vector.broadcast %c16_i32_3 : i32 to vector<128x128xi32>
    %28 = arith.shrui %26, %27 : vector<128x128xi32>
    %29 = arith.xori %26, %28 : vector<128x128xi32>
    %c8_i32 = arith.constant 8 : i32
    %30 = vector.broadcast %c8_i32 : i32 to vector<128x128xi32>
    %31 = arith.shrui %29, %30 : vector<128x128xi32>
    %32 = arith.sitofp %31 : vector<128x128xi32> to vector<128x128xf32>
    %cst = arith.constant 5.96046448E-8 : f32
    %33 = vector.broadcast %cst : f32 to vector<128x128xf32>
    %34 = arith.mulf %32, %33 : vector<128x128xf32>
    %cst_4 = arith.constant 2.98023224E-8 : f32
    %35 = vector.broadcast %cst_4 : f32 to vector<128x128xf32>
    %36 = arith.addf %34, %35 : vector<128x128xf32>
    %cst_5 = arith.constant 1.000000e+00 : f32
    %37 = vector.broadcast %cst_5 : f32 to vector<128x128xf32>
    %38 = arith.subf %37, %36 : vector<128x128xf32>
    %39 = arith.minimumf %36, %38 : vector<128x128xf32>
    %40 = math.log %39 : vector<128x128xf32>
    %cst_6 = arith.constant -2.000000e+00 : f32
    %41 = vector.broadcast %cst_6 : f32 to vector<128x128xf32>
    %42 = arith.mulf %41, %40 : vector<128x128xf32>
    %43 = math.sqrt %42 : vector<128x128xf32>
    %cst_7 = arith.constant 1.032800e-02 : f32
    %44 = vector.broadcast %cst_7 : f32 to vector<128x128xf32>
    %45 = arith.mulf %43, %44 : vector<128x128xf32>
    %cst_8 = arith.constant 0.802852988 : f32
    %46 = vector.broadcast %cst_8 : f32 to vector<128x128xf32>
    %47 = arith.addf %46, %45 : vector<128x128xf32>
    %48 = arith.mulf %43, %47 : vector<128x128xf32>
    %cst_9 = arith.constant 2.515517 : f32
    %49 = vector.broadcast %cst_9 : f32 to vector<128x128xf32>
    %50 = arith.addf %49, %48 : vector<128x128xf32>
    %cst_10 = arith.constant 1.308000e-03 : f32
    %51 = vector.broadcast %cst_10 : f32 to vector<128x128xf32>
    %52 = arith.mulf %43, %51 : vector<128x128xf32>
    %cst_11 = arith.constant 1.892690e-01 : f32
    %53 = vector.broadcast %cst_11 : f32 to vector<128x128xf32>
    %54 = arith.addf %53, %52 : vector<128x128xf32>
    %55 = arith.mulf %43, %54 : vector<128x128xf32>
    %cst_12 = arith.constant 1.43278801 : f32
    %56 = vector.broadcast %cst_12 : f32 to vector<128x128xf32>
    %57 = arith.addf %56, %55 : vector<128x128xf32>
    %58 = arith.mulf %43, %57 : vector<128x128xf32>
    %cst_13 = arith.constant 1.000000e+00 : f32
    %59 = vector.broadcast %cst_13 : f32 to vector<128x128xf32>
    %60 = arith.addf %59, %58 : vector<128x128xf32>
    %61 = arith.divf %50, %60 : vector<128x128xf32>
    %62 = arith.subf %43, %61 : vector<128x128xf32>
    %cst_14 = arith.constant 5.000000e-01 : f32
    %63 = vector.broadcast %cst_14 : f32 to vector<128x128xf32>
    %64 = arith.cmpf olt, %36, %63 : vector<128x128xf32>
    %cst_15 = arith.constant 0.000000e+00 : f32
    %65 = vector.broadcast %cst_15 : f32 to vector<128x128xf32>
    %66 = arith.subf %65, %62 : vector<128x128xf32>
    %67 = arith.select %64, %66, %62 : vector<128x128xi1>, vector<128x128xf32>
    %c0_16 = arith.constant 0 : index
    %c0_17 = arith.constant 0 : index
    %68 = vector.load %arg5[%c0_16, %c0_17] : memref<128x128xf32, #tpu.memory_space<vmem>>, vector<128x128xf32>
    %c0_18 = arith.constant 0 : index
    %c0_19 = arith.constant 0 : index
    %69 = vector.load %arg6[%c0_18, %c0_19] : memref<128x128xf32, #tpu.memory_space<vmem>>, vector<128x128xf32>
    %cst_20 = arith.constant 0.000000e+00 : f32
    %70 = vector.broadcast %cst_20 : f32 to vector<128x128xf32>
    %71 = arith.maximumf %69, %70 : vector<128x128xf32>
    %72 = math.absf %69 : vector<128x128xf32>
    %cst_21 = arith.constant 0.000000e+00 : f32
    %73 = vector.broadcast %cst_21 : f32 to vector<128x128xf32>
    %74 = arith.subf %73, %72 : vector<128x128xf32>
    %75 = math.exp %74 : vector<128x128xf32>
    %cst_22 = arith.constant 1.000000e+00 : f32
    %76 = vector.broadcast %cst_22 : f32 to vector<128x128xf32>
    %77 = arith.addf %76, %75 : vector<128x128xf32>
    %78 = math.log %77 : vector<128x128xf32>
    %79 = arith.addf %71, %78 : vector<128x128xf32>
    %80 = arith.mulf %79, %67 : vector<128x128xf32>
    %81 = arith.addf %68, %80 : vector<128x128xf32>
    %c0_23 = arith.constant 0 : index
    %c0_24 = arith.constant 0 : index
    %82 = vector.load %arg10[%c0_23, %c0_24] : memref<128x128xf32, #tpu.memory_space<vmem>>, vector<128x128xf32>
    tpu.vector_store %arg10[%c0_23, %c0_24], %81 {strides = array<i32>} : memref<128x128xf32, #tpu.memory_space<vmem>>, vector<128x128xf32>,
    %c0_25 = arith.constant 0 : index
    %c0_26 = arith.constant 0 : index
    %83 = vector.load %arg12[%c0_25, %c0_26] : memref<8x128xf32, #tpu.memory_space<vmem>>, vector<8x128xf32>
    %c0_27 = arith.constant 0 : index
    %c0_28 = arith.constant 0 : index
    %84 = vector.load %arg4[%c0_27, %c0_28] : memref<8x128xf32, #tpu.memory_space<vmem>>, vector<8x128xf32>
    %cst_29 = arith.constant dense<0.000000e+00> : vector<8x128xf32>
    %85 = tpu.matmul %84, %81, %cst_29 {dimension_numbers = #tpu.dot_dimension_numbers<[1], [1], [0], [0], [0, 0, 1, 0], [], []>} : vector<8x128xf32>, vector<128x128xf32>, vector<8x128xf32> -> vector<8x128xf32>
    %86 = arith.addf %83, %85 : vector<8x128xf32>
    %c0_30 = arith.constant 0 : index
    %c0_31 = arith.constant 0 : index
    %87 = vector.load %arg12[%c0_30, %c0_31] : memref<8x128xf32, #tpu.memory_space<vmem>>, vector<8x128xf32>
    tpu.vector_store %arg12[%c0_30, %c0_31], %86 {strides = array<i32>} : memref<8x128xf32, #tpu.memory_space<vmem>>, vector<8x128xf32>,
    %c0_i32_32 = arith.constant 0 : i32
    %88 = arith.cmpi eq, %arg2, %c0_i32_32 : i32
    %89 = arith.extui %88 : i1 to i32
    %c0_i32_33 = arith.constant 0 : i32
    %90 = arith.cmpi ne, %89, %c0_i32_33 : i32
    scf.if %90 {
      %c0_34 = arith.constant 0 : index
      %c0_35 = arith.constant 0 : index
      %91 = vector.load %arg7[%c0_34, %c0_35] : memref<1x128xf32, #tpu.memory_space<vmem>>, vector<1x128xf32>
      %92 = tpu.iota {dimensions = array<i32: 1>} : vector<1x128xi32>
      %c128_i32_36 = arith.constant 128 : i32
      %93 = arith.muli %arg1, %c128_i32_36 : i32
      %94 = vector.broadcast %93 : i32 to vector<1x128xi32>
      %95 = arith.addi %92, %94 : vector<1x128xi32>
      %c1 = arith.constant 1 : index
      %96 = memref.load %arg3[%c1] : memref<2xi32, #tpu.memory_space<smem>>
      %97 = vector.broadcast %96 : i32 to vector<1x128xi32>
      %98 = arith.xori %95, %97 : vector<1x128xi32>
      %c16_i32_37 = arith.constant 16 : i32
      %99 = vector.broadcast %c16_i32_37 : i32 to vector<1x128xi32>
      %100 = arith.shrui %98, %99 : vector<1x128xi32>
      %101 = arith.xori %98, %100 : vector<1x128xi32>
      %c2146121005_i32_38 = arith.constant 2146121005 : i32
      %102 = vector.broadcast %c2146121005_i32_38 : i32 to vector<1x128xi32>
      %103 = arith.muli %101, %102 : vector<1x128xi32>
      %c15_i32_39 = arith.constant 15 : i32
      %104 = vector.broadcast %c15_i32_39 : i32 to vector<1x128xi32>
      %105 = arith.shrui %103, %104 : vector<1x128xi32>
      %106 = arith.xori %103, %105 : vector<1x128xi32>
      %c-2073254261_i32_40 = arith.constant -2073254261 : i32
      %107 = vector.broadcast %c-2073254261_i32_40 : i32 to vector<1x128xi32>
      %108 = arith.muli %106, %107 : vector<1x128xi32>
      %c16_i32_41 = arith.constant 16 : i32
      %109 = vector.broadcast %c16_i32_41 : i32 to vector<1x128xi32>
      %110 = arith.shrui %108, %109 : vector<1x128xi32>
      %111 = arith.xori %108, %110 : vector<1x128xi32>
      %c8_i32_42 = arith.constant 8 : i32
      %112 = vector.broadcast %c8_i32_42 : i32 to vector<1x128xi32>
      %113 = arith.shrui %111, %112 : vector<1x128xi32>
      %114 = arith.sitofp %113 : vector<1x128xi32> to vector<1x128xf32>
      %cst_43 = arith.constant 5.96046448E-8 : f32
      %115 = vector.broadcast %cst_43 : f32 to vector<1x128xf32>
      %116 = arith.mulf %114, %115 : vector<1x128xf32>
      %cst_44 = arith.constant 2.98023224E-8 : f32
      %117 = vector.broadcast %cst_44 : f32 to vector<1x128xf32>
      %118 = arith.addf %116, %117 : vector<1x128xf32>
      %cst_45 = arith.constant 1.000000e+00 : f32
      %119 = vector.broadcast %cst_45 : f32 to vector<1x128xf32>
      %120 = arith.subf %119, %118 : vector<1x128xf32>
      %121 = arith.minimumf %118, %120 : vector<1x128xf32>
      %122 = math.log %121 : vector<1x128xf32>
      %cst_46 = arith.constant -2.000000e+00 : f32
      %123 = vector.broadcast %cst_46 : f32 to vector<1x128xf32>
      %124 = arith.mulf %123, %122 : vector<1x128xf32>
      %125 = math.sqrt %124 : vector<1x128xf32>
      %cst_47 = arith.constant 1.032800e-02 : f32
      %126 = vector.broadcast %cst_47 : f32 to vector<1x128xf32>
      %127 = arith.mulf %125, %126 : vector<1x128xf32>
      %cst_48 = arith.constant 0.802852988 : f32
      %128 = vector.broadcast %cst_48 : f32 to vector<1x128xf32>
      %129 = arith.addf %128, %127 : vector<1x128xf32>
      %130 = arith.mulf %125, %129 : vector<1x128xf32>
      %cst_49 = arith.constant 2.515517 : f32
      %131 = vector.broadcast %cst_49 : f32 to vector<1x128xf32>
      %132 = arith.addf %131, %130 : vector<1x128xf32>
      %cst_50 = arith.constant 1.308000e-03 : f32
      %133 = vector.broadcast %cst_50 : f32 to vector<1x128xf32>
      %134 = arith.mulf %125, %133 : vector<1x128xf32>
      %cst_51 = arith.constant 1.892690e-01 : f32
      %135 = vector.broadcast %cst_51 : f32 to vector<1x128xf32>
      %136 = arith.addf %135, %134 : vector<1x128xf32>
      %137 = arith.mulf %125, %136 : vector<1x128xf32>
      %cst_52 = arith.constant 1.43278801 : f32
      %138 = vector.broadcast %cst_52 : f32 to vector<1x128xf32>
      %139 = arith.addf %138, %137 : vector<1x128xf32>
      %140 = arith.mulf %125, %139 : vector<1x128xf32>
      %cst_53 = arith.constant 1.000000e+00 : f32
      %141 = vector.broadcast %cst_53 : f32 to vector<1x128xf32>
      %142 = arith.addf %141, %140 : vector<1x128xf32>
      %143 = arith.divf %132, %142 : vector<1x128xf32>
      %144 = arith.subf %125, %143 : vector<1x128xf32>
      %cst_54 = arith.constant 5.000000e-01 : f32
      %145 = vector.broadcast %cst_54 : f32 to vector<1x128xf32>
      %146 = arith.cmpf olt, %118, %145 : vector<1x128xf32>
      %cst_55 = arith.constant 0.000000e+00 : f32
      %147 = vector.broadcast %cst_55 : f32 to vector<1x128xf32>
      %148 = arith.subf %147, %144 : vector<1x128xf32>
      %149 = arith.select %146, %148, %144 : vector<1x128xi1>, vector<1x128xf32>
      %c0_56 = arith.constant 0 : index
      %c0_57 = arith.constant 0 : index
      %150 = vector.load %arg8[%c0_56, %c0_57] : memref<1x128xf32, #tpu.memory_space<vmem>>, vector<1x128xf32>
      %cst_58 = arith.constant 0.000000e+00 : f32
      %151 = vector.broadcast %cst_58 : f32 to vector<1x128xf32>
      %152 = arith.maximumf %150, %151 : vector<1x128xf32>
      %153 = math.absf %150 : vector<1x128xf32>
      %cst_59 = arith.constant 0.000000e+00 : f32
      %154 = vector.broadcast %cst_59 : f32 to vector<1x128xf32>
      %155 = arith.subf %154, %153 : vector<1x128xf32>
      %156 = math.exp %155 : vector<1x128xf32>
      %cst_60 = arith.constant 1.000000e+00 : f32
      %157 = vector.broadcast %cst_60 : f32 to vector<1x128xf32>
      %158 = arith.addf %157, %156 : vector<1x128xf32>
      %159 = math.log %158 : vector<1x128xf32>
      %160 = arith.addf %152, %159 : vector<1x128xf32>
      %161 = arith.mulf %160, %149 : vector<1x128xf32>
      %162 = arith.addf %91, %161 : vector<1x128xf32>
      %c0_61 = arith.constant 0 : index
      %c0_62 = arith.constant 0 : index
      %163 = vector.load %arg11[%c0_61, %c0_62] : memref<1x128xf32, #tpu.memory_space<vmem>>, vector<1x128xf32>
      tpu.vector_store %arg11[%c0_61, %c0_62], %162 {strides = array<i32>} : memref<1x128xf32, #tpu.memory_space<vmem>>, vector<1x128xf32>,
      %c0_63 = arith.constant 0 : index
      %c0_64 = arith.constant 0 : index
      %164 = vector.load %arg12[%c0_63, %c0_64] : memref<8x128xf32, #tpu.memory_space<vmem>>, vector<8x128xf32>
      %165 = vector.broadcast %162 : vector<1x128xf32> to vector<8x128xf32>
      %166 = arith.addf %164, %165 : vector<8x128xf32>
      %c0_65 = arith.constant 0 : index
      %c0_66 = arith.constant 0 : index
      %167 = vector.load %arg9[%c0_65, %c0_66] : memref<8x128xf32, #tpu.memory_space<vmem>>, vector<8x128xf32>
      tpu.vector_store %arg9[%c0_65, %c0_66], %166 {strides = array<i32>} : memref<8x128xf32, #tpu.memory_space<vmem>>, vector<8x128xf32>,
    } else {
    }
    return
  }
  func.func @transform_0(%arg0: i32, %arg1: i32, %arg2: i32, %arg3: memref<2xi32, #tpu.memory_space<smem>>) -> (i32, i32) {
    %c0_i32 = arith.constant 0 : i32
    return %arg0, %arg2 : i32, i32
  }
  func.func @transform_1(%arg0: i32, %arg1: i32, %arg2: i32, %arg3: memref<2xi32, #tpu.memory_space<smem>>) -> (i32, i32) {
    %c0_i32 = arith.constant 0 : i32
    return %arg1, %arg2 : i32, i32
  }
  func.func @transform_2(%arg0: i32, %arg1: i32, %arg2: i32, %arg3: memref<2xi32, #tpu.memory_space<smem>>) -> (i32, i32) {
    %c0_i32 = arith.constant 0 : i32
    return %arg1, %arg2 : i32, i32
  }
  func.func @transform_3(%arg0: i32, %arg1: i32, %arg2: i32, %arg3: memref<2xi32, #tpu.memory_space<smem>>) -> (i32, i32) {
    %c0_i32 = arith.constant 0 : i32
    %c0_i32_0 = arith.constant 0 : i32
    return %c0_i32, %arg1 : i32, i32
  }
  func.func @transform_4(%arg0: i32, %arg1: i32, %arg2: i32, %arg3: memref<2xi32, #tpu.memory_space<smem>>) -> (i32, i32) {
    %c0_i32 = arith.constant 0 : i32
    %c0_i32_0 = arith.constant 0 : i32
    return %c0_i32, %arg1 : i32, i32
  }
  func.func @transform_5(%arg0: i32, %arg1: i32, %arg2: i32, %arg3: memref<2xi32, #tpu.memory_space<smem>>) -> (i32, i32) {
    %c0_i32 = arith.constant 0 : i32
    return %arg0, %arg1 : i32, i32
  }
  func.func @transform_6(%arg0: i32, %arg1: i32, %arg2: i32, %arg3: memref<2xi32, #tpu.memory_space<smem>>) -> (i32, i32) {
    %c0_i32 = arith.constant 0 : i32
    return %arg1, %arg2 : i32, i32
  }
  func.func @transform_7(%arg0: i32, %arg1: i32, %arg2: i32, %arg3: memref<2xi32, #tpu.memory_space<smem>>) -> (i32, i32) {
    %c0_i32 = arith.constant 0 : i32
    %c0_i32_0 = arith.constant 0 : i32
    return %c0_i32, %arg1 : i32, i32
  }
}

</mosaic_0001>

<bundles_post_ra>
// kernel: tpu_custom_call.1
= control target key start
LH: loop header
LB: loop body
LE: loop exit
PB: predicated region body
PF: predicated region fallthrough
CT: control target
= control target key end

     0   :  { %s1832_s30 = smov [#allocation4]   ;;  %s2773_s0 = inlined_call_operand.hbm [shape: s32[2], index: 0, kind: input, shape index: {}]   ;;  %s2774_s1 = inlined_call_operand.hbm [shape: f32[8,128], index: 1, kind: input, shape index: {}]   ;;  %s2775_s2 = inlined_call_operand.hbm [shape: f32[128,128], index: 2, kind: input, shape index: {}]   ;;  %s2776_s3 = inlined_call_operand.hbm [shape: f32[128,128], index: 3, kind: input, shape index: {}]   ;;  %s2777_s4 = inlined_call_operand.vmem [shape: f32[1,128], index: 4, kind: input, shape index: {}]   ;;  %s2778_s5 = inlined_call_operand.vmem [shape: f32[1,128], index: 5, kind: input, shape index: {}]   ;;  %s2779_s6 = inlined_call_operand.hbm [shape: f32[8,128], index: 6, kind: output, shape index: {0}]   ;;  %s2780_s7 = inlined_call_operand.hbm [shape: f32[128,128], index: 7, kind: output, shape index: {1}]   ;;  %s2781_s8 = inlined_call_operand.hbm [shape: f32[1,128], index: 8, kind: output, shape index: {2}]  }
   0x1   :  { %s15_s29 = sshll.u32 %s2773_s0, 4  ;;  %s16_s29 = int_to_ptr.hbm [resolvable:$true] %s15_s29 }
   0x2   :  { %18 = dma.hbm_to_smem %s16_s29, 16, %s1832_s30, [#allocation3] }
   0x3   :  { %1822 = dma.done.wait [#allocation3], 16 }
   0x4   :  { %1823 = vsyncadd [#allocation3], 4294967280 }
   0x5   :  { %21 = sfence }
   0x6   :  { %22 = vsyncpa [#allocation6], 0 }
   0x7   :  { %23 = vsyncpa [#allocation9], 0 }
   0x8   :  { %24 = vsyncpa [#allocation7], 0  ;;  %s41_s11 = sshll.u32 %s2775_s2, 4  ;;  %s42_s11 = int_to_ptr.hbm [resolvable:$true] %s41_s11 }
   0x9   :  { %25 = vsyncpa [#allocation13], 0  ;;  %s1833_s12 = smov [#allocation8]   ;;  %s31_s15 = sshll.u32 %s2774_s1, 4  ;;  %s32_s15 = int_to_ptr.hbm [resolvable:$true] %s31_s15 }
   0xa   :  { %s43_s13 = sshll.u32 %s1833_s12, 4  ;;  %s1834_s16 = smov 128   ;;  %s44_s13 = int_to_ptr.vmem [resolvable:$true] %s43_s13 }
   0xb   :  { %s1835_s17 = smov 8   ;;  %s1836_s18 = smov [#allocation5]  }
   0xc   :  { %49 = dma.hbm_to_vmem [thread:$0]  %s42_s11, 2048, %s44_s13, [#allocation9], %s1834_s16, %s1834_s16, %s1835_s17  }
   0xd   :  { %s33_s19 = sshll.u32 %s1836_s18, 4  ;;  %s54_s21 = sshll.u32 %s2776_s3, 4  ;;  %s34_s19 = int_to_ptr.vmem [resolvable:$true] %s33_s19  ;;  %s55_s21 = int_to_ptr.hbm [resolvable:$true] %s54_s21 }
   0xe   :  { %36 = dma.hbm_to_vmem [thread:$0]  %s32_s15, 128, %s34_s19, [#allocation6]  }
   0xf   :  { %s1837_s22 = smov [#allocation10]  }
  0x10   :  { %s56_s23 = sshll.u32 %s1837_s22, 4  ;;  %s57_s23 = int_to_ptr.vmem [resolvable:$true] %s56_s23 }
  0x11   :  { %62 = dma.hbm_to_vmem [thread:$0]  %s55_s21, 2048, %s57_s23, [#allocation9], %s1834_s16, %s1834_s16, %s1835_s17  }
  0x12   :  { %1824 = dma.done.wait [#allocation6], 128  }
  0x13   :  { %1825 = vsyncadd [#allocation6], 4294967168 }
  0x14   :  { %1826 = dma.done.wait [#allocation9], 4096  }
  0x15   :  { %1827 = vsyncadd [#allocation9], 4294963200  ;;  %v84_v0 = vlaneseq  ;;  %s156_s1 = sld [smem:[#allocation4]]  ;;  %s1838_s24 = smov [#allocation12]  }
  0x16   :  { %s1486_s3 = sld [smem:[#allocation4 + $0x1]]  ;;  %s1450_s25 = sshll.u32 %s1838_s24, 4  ;;  %s1451_s25 = int_to_ptr.vmem [resolvable:$true] %s1450_s25 }
  0x17   :  { %v1904_v1 = vshrl.u32 %v84_v0, 7  ;;  %v1906_v2 = vand.u32 127, %v84_v0  ;;  %s1452_s28 = sshll.u32 %s2780_s7, 4  ;;  %s1466_s11 = sshll.u32 %s2781_s8, 4  ;;  %s1453_s28 = int_to_ptr.hbm [resolvable:$true] %s1452_s28  ;;  %s1467_s11 = int_to_ptr.hbm [resolvable:$true] %s1466_s11 }
  0x18   :  { %s1840_s14 = smov [#allocation11]  }
  0x19   :  { %v100_v3 = vadd.s32 120, %v1904_v1  ;;  %v99_v4 = vadd.s32 112, %v1904_v1  ;;  %v98_v5 = vadd.s32 104, %v1904_v1  ;;  %v97_v6 = vadd.s32 96, %v1904_v1  ;;  %s1440_s0 = sshll.u32 %s1840_s14, 4  ;;  %s1441_s0 = int_to_ptr.vmem [resolvable:$true] %s1440_s0 }
  0x1a   :  { %v96_v7 = vadd.s32 88, %v1904_v1  ;;  %v95_v14 = vadd.s32 80, %v1904_v1  ;;  %v94_v51 = vadd.s32 72, %v1904_v1 }
  0x1b   :  { %v139_v8 = vmul.u32 128, %v100_v3  ;;  %v138_v9 = vmul.u32 128, %v99_v4  ;;  %v137_v10 = vmul.u32 128, %v98_v5  ;;  %v136_v11 = vmul.u32 128, %v97_v6 }
  0x1c   :  { %v1913_v12 = vstv %s156_s1  ;;  %v135_v13 = vmul.u32 128, %v96_v7  ;;  %v134_v20 = vmul.u32 128, %v95_v14  ;;  %v133_v58 = vmul.u32 128, %v94_v51 }
  0x1d   :  { %v155_v15 = vadd.s32 %v139_v8, %v1906_v2  ;;  %v154_v16 = vadd.s32 %v138_v9, %v1906_v2  ;;  %v153_v17 = vadd.s32 %v137_v10, %v1906_v2  ;;  %v152_v18 = vadd.s32 %v136_v11, %v1906_v2 }
  0x1e   :  { %v151_v19 = vadd.s32 %v135_v13, %v1906_v2  ;;  %v150_v26 = vadd.s32 %v134_v20, %v1906_v2  ;;  %v149_v3 = vadd.s32 %v133_v58, %v1906_v2 }
  0x1f   :  { %v173_v21 = vxor.u32 %v1913_v12, %v155_v15  ;;  %v172_v22 = vxor.u32 %v1913_v12, %v154_v16  ;;  %v171_v23 = vxor.u32 %v1913_v12, %v153_v17  ;;  %v170_v24 = vxor.u32 %v1913_v12, %v152_v18 }
  0x20   :  { %v169_v25 = vxor.u32 %v1913_v12, %v151_v19  ;;  %v168_v32 = vxor.u32 %v1913_v12, %v150_v26  ;;  %v167_v10 = vxor.u32 %v1913_v12, %v149_v3 }
  0x21   :  { %v189_v27 = vshrl.u32 %v173_v21, 16  ;;  %v188_v28 = vshrl.u32 %v172_v22, 16  ;;  %v187_v29 = vshrl.u32 %v171_v23, 16  ;;  %v186_v30 = vshrl.u32 %v170_v24, 16 }
  0x22   :  { %v185_v31 = vshrl.u32 %v169_v25, 16  ;;  %v184_v38 = vshrl.u32 %v168_v32, 16  ;;  %v183_v18 = vshrl.u32 %v167_v10, 16 }
  0x23   :  { %v205_v33 = vxor.u32 %v189_v27, %v173_v21  ;;  %v204_v34 = vxor.u32 %v188_v28, %v172_v22  ;;  %v203_v35 = vxor.u32 %v187_v29, %v171_v23  ;;  %v202_v36 = vxor.u32 %v186_v30, %v170_v24 }
  0x24   :  { %v201_v37 = vxor.u32 %v185_v31, %v169_v25  ;;  %v200_v44 = vxor.u32 %v184_v38, %v168_v32  ;;  %v199_v25 = vxor.u32 %v183_v18, %v167_v10  ;;  %v1964_v18 = vld [vmem:[#allocation10 + $0x70] sm:$0xff] }
  0x25   :  { %v221_v39 = vmul.u32 2146121005, %v205_v33  ;;  %v220_v40 = vmul.u32 2146121005, %v204_v34  ;;  %v219_v41 = vmul.u32 2146121005, %v203_v35 }
  0x26   :  { %v218_v42 = vmul.u32 2146121005, %v202_v36  ;;  %v217_v43 = vmul.u32 2146121005, %v201_v37  ;;  %v216_v50 = vmul.u32 2146121005, %v200_v44 }
  0x27   :  { %v237_v45 = vshrl.u32 %v221_v39, 15  ;;  %v236_v46 = vshrl.u32 %v220_v40, 15  ;;  %v235_v47 = vshrl.u32 %v219_v41, 15  ;;  %v215_v32 = vmul.u32 2146121005, %v199_v25 }
  0x28   :  { %v234_v48 = vshrl.u32 %v218_v42, 15  ;;  %v233_v49 = vshrl.u32 %v217_v43, 15  ;;  %v232_v57 = vshrl.u32 %v216_v50, 15  ;;  %v93_v25 = vadd.s32 64, %v1904_v1 }
  0x29   :  { %v253_v52 = vxor.u32 %v237_v45, %v221_v39  ;;  %v252_v53 = vxor.u32 %v236_v46, %v220_v40  ;;  %v251_v54 = vxor.u32 %v235_v47, %v219_v41  ;;  %v231_v39 = vshrl.u32 %v215_v32, 15 }
  0x2a   :  { %v250_v55 = vxor.u32 %v234_v48, %v218_v42  ;;  %v249_v56 = vxor.u32 %v233_v49, %v217_v43  ;;  %v248_v0 = vxor.u32 %v232_v57, %v216_v50 }
  0x2b   :  { %v269_v59 = vmul.u32 2221713035, %v253_v52  ;;  %v268_v60 = vmul.u32 2221713035, %v252_v53  ;;  %v267_v61 = vmul.u32 2221713035, %v251_v54  ;;  %v247_v46 = vxor.u32 %v231_v39, %v215_v32 }
  0x2c   :  { %v266_v62 = vmul.u32 2221713035, %v250_v55  ;;  %v265_v63 = vmul.u32 2221713035, %v249_v56  ;;  %v264_v9 = vmul.u32 2221713035, %v248_v0 }
  0x2d   :  { %v285_v4 = vshrl.u32 %v269_v59, 16  ;;  %v284_v5 = vshrl.u32 %v268_v60, 16  ;;  %v283_v6 = vshrl.u32 %v267_v61, 16  ;;  %v263_v52 = vmul.u32 2221713035, %v247_v46 }
  0x2e   :  { %v282_v7 = vshrl.u32 %v266_v62, 16  ;;  %v281_v8 = vshrl.u32 %v265_v63, 16  ;;  %v280_v17 = vshrl.u32 %v264_v9, 16 }
  0x2f   :  { %v301_v11 = vxor.u32 %v285_v4, %v269_v59  ;;  %v300_v13 = vxor.u32 %v284_v5, %v268_v60  ;;  %v299_v14 = vxor.u32 %v283_v6, %v267_v61  ;;  %v279_v58 = vshrl.u32 %v263_v52, 16 }
  0x30   :  { %v298_v15 = vxor.u32 %v282_v7, %v266_v62  ;;  %v297_v16 = vxor.u32 %v281_v8, %v265_v63  ;;  %v296_v24 = vxor.u32 %v280_v17, %v264_v9  ;;  %v1957_v9 = vld [vmem:[#allocation10 + $0x78] sm:$0xff] }
  0x31   :  { %v317_v19 = vshrl.u32 %v301_v11, 8  ;;  %v316_v20 = vshrl.u32 %v300_v13, 8  ;;  %v315_v21 = vshrl.u32 %v299_v14, 8  ;;  %v295_v60 = vxor.u32 %v279_v58, %v263_v52 }
  0x32   :  { %v314_v22 = vshrl.u32 %v298_v15, 8  ;;  %v313_v23 = vshrl.u32 %v297_v16, 8  ;;  %v312_v31 = vshrl.u32 %v296_v24, 8  ;;  %v1165_v11 = vand.u32 2147483647, %v1957_v9 }
  0x33   :  { %v333_v26 = vcvt.s32.f32 %v317_v19  ;;  %v332_v27 = vcvt.s32.f32 %v316_v20  ;;  %v331_v28 = vcvt.s32.f32 %v315_v21  ;;  %v311_v0 = vshrl.u32 %v295_v60, 8 }
  0x34   :  { %v330_v29 = vcvt.s32.f32 %v314_v22  ;;  %v329_v30 = vcvt.s32.f32 %v313_v23  ;;  %v328_v38 = vcvt.s32.f32 %v312_v31  ;;  %v1181_v16 = vsub.f32 0.0, %v1165_v11 }
  0x35   :  { %v349_v33 = vmul.f32 5.9604645e-08, %v333_v26  ;;  %v348_v34 = vmul.f32 5.9604645e-08, %v332_v27  ;;  %v347_v35 = vmul.f32 5.9604645e-08, %v331_v28  ;;  %v327_v15 = vcvt.s32.f32 %v311_v0 }
  0x36   :  { %v346_v36 = vmul.f32 5.9604645e-08, %v330_v29  ;;  %v345_v37 = vmul.f32 5.9604645e-08, %v329_v30  ;;  %v344_v45 = vmul.f32 5.9604645e-08, %v328_v38  ;;  %v1212_v21 = vmul.f32 1.442695, %v1181_v16 }
  0x37   :  { %v1931_v40 = vadd.f32 2.9802322e-08, %v349_v33  ;;  %v1933_v41 = vadd.f32 2.9802322e-08, %v348_v34  ;;  %v1935_v42 = vadd.f32 2.9802322e-08, %v347_v35  ;;  %v1164_v22 = vand.u32 2147483647, %v1964_v18  ;;  %v1979_v34 = vld [vmem:[#allocation10 + $0x68] sm:$0xff] }
  0x38   :  { %v1937_v43 = vadd.f32 2.9802322e-08, %v346_v36  ;;  %v1939_v44 = vadd.f32 2.9802322e-08, %v345_v37  ;;  %v1945_v51 = vadd.f32 2.9802322e-08, %v344_v45  ;;  %v343_v23 = vmul.f32 5.9604645e-08, %v327_v15 }
  0x39   :  { %v381_v47 = vsub.f32 1.0, %v1931_v40  ;;  %v380_v48 = vsub.f32 1.0, %v1933_v41  ;;  %v379_v49 = vsub.f32 1.0, %v1935_v42  ;;  %v1180_v26 = vsub.f32 0.0, %v1164_v22 }
  0x3a   :  { %v378_v50 = vsub.f32 1.0, %v1937_v43  ;;  %v377_v57 = vsub.f32 1.0, %v1939_v44  ;;  %v376_v59 = vsub.f32 1.0, %v1945_v51  ;;  %v1975_v32 = vadd.f32 2.9802322e-08, %v343_v23 }
  0x3b   :  { %v397_v53 = vmin.f32 %v1931_v40, %v381_v47  ;;  %v396_v54 = vmin.f32 %v1933_v41, %v380_v48  ;;  %v395_v55 = vmin.f32 %v1935_v42, %v379_v49  ;;  %v1210_v31 = vmul.f32 1.442695, %v1180_v26 }
  0x3c   :  { %v394_v56 = vmin.f32 %v1937_v43, %v378_v50  ;;  %v393_v61 = vmin.f32 %v1939_v44, %v377_v57  ;;  %v392_v62 = vmin.f32 %v1945_v51, %v376_v59  ;;  %v132_v36 = vmul.u32 128, %v93_v25 }
  0x3d   :  { %1496 = vlog2.f32 %v397_v53  ;;  %v1163_v38 = vand.u32 2147483647, %v1979_v34  ;;  %v375_v0 = vsub.f32 1.0, %v1975_v32 }
  0x3e   :  { %1498 = vlog2.f32 %v396_v54 }
  0x3f   :  { %1500 = vlog2.f32 %v395_v55  ;;  %v1179_v50 = vsub.f32 0.0, %v1163_v38  ;;  %v391_v23 = vmin.f32 %v1975_v32, %v375_v0 }
  0x40   :  { %1502 = vlog2.f32 %v394_v56  ;;  %v148_v56 = vadd.s32 %v132_v36, %v1906_v2 }
  0x41   :  { %1504 = vlog2.f32 %v393_v61  ;;  %v1994_v61 = vld [vmem:[#allocation10 + $0x60] sm:$0xff] }
  0x42   :  { %1506 = vlog2.f32 %v392_v62 }
  0x43   :  { %v1497_v63 = vpop.eup %1496 }
  0x44   :  { %v1499_v3 = vpop.eup %1498  ;;  %v429_v4 = vmul.f32 0.6931472, %v1497_v63  ;;  %v1208_v63 = vmul.f32 1.442695, %v1179_v50 }
  0x45   :  { %v1501_v5 = vpop.eup %1500  ;;  %v427_v6 = vmul.f32 0.6931472, %v1499_v3 }
  0x46   :  { %v1503_v7 = vpop.eup %1502  ;;  %v1955_v8 = vmul.f32 -2.0, %v429_v4  ;;  %v425_v10 = vmul.f32 0.6931472, %v1501_v5 }
  0x47   :  { %v1960_v13 = vmul.f32 -2.0, %v427_v6  ;;  %v423_v14 = vmul.f32 0.6931472, %v1503_v7  ;;  %v1505_v17 = vpop.eup %1504  ;;  %v1162_v7 = vand.u32 2147483647, %v1994_v61 }
  0x48   :  { %1508 = vrsqrt.f32 %v1955_v8  ;;  %v1966_v19 = vmul.f32 -2.0, %v425_v10  ;;  %v1507_v24 = vpop.eup %1506  ;;  %v421_v27 = vmul.f32 0.6931472, %v1505_v17  ;;  %vm633_vm0 = vcmp.eq.f32.partialorder %v1955_v8, inf }
  0x49   :  { %1510 = vrsqrt.f32 %v1960_v13  ;;  %v1968_v20 = vmul.f32 -2.0, %v423_v14  ;;  %v419_v35 = vmul.f32 0.6931472, %v1507_v24  ;;  %vm635_vm1 = vcmp.eq.f32.partialorder %v1955_v8, 0.0 }
  0x4a   :  { %1512 = vrsqrt.f32 %v1966_v19  ;;  %v1982_v39 = vmul.f32 -2.0, %v421_v27  ;;  %v636_v46 = vand.u32 2147483648, %v1955_v8  ;;  %vm621_vm2 = vcmp.eq.f32.partialorder %v1960_v13, inf }
  0x4b   :  { %1514 = vrsqrt.f32 %v1968_v20  ;;  %vm623_vm3 = vcmp.eq.f32.partialorder %v1960_v13, 0.0  ;;  %v624_v54 = vand.u32 2147483648, %v1960_v13  ;;  %v1990_v55 = vmul.f32 -2.0, %v419_v35 }
  0x4c   :  { %1516 = vpow2.f32 %v1212_v21  ;;  %vm609_vm4 = vcmp.eq.f32.partialorder %v1966_v19, inf  ;;  %vm611_vm5 = vcmp.eq.f32.partialorder %v1966_v19, 0.0  ;;  %v612_v22 = vand.u32 2147483648, %v1966_v19 }
  0x4d   :  { %1518 = vpow2.f32 %v1210_v31  ;;  %v2007_v24 = vxor.u32 %v1913_v12, %v148_v56  ;;  %vm597_vm6 = vcmp.eq.f32.partialorder %v1968_v20, inf  ;;  %vm599_vm7 = vcmp.eq.f32.partialorder %v1968_v20, 0.0 }
  0x4e   :  { %v1509_v28 = vpop.eup %1508  ;;  %1520 = vrsqrt.f32 %v1982_v39  ;;  %vm585_vm8 = vcmp.eq.f32.partialorder %v1982_v39, inf  ;;  %vm587_vm12 = vcmp.eq.f32.partialorder %v1982_v39, 0.0 }
  0x4f   :  { %v1511_v29 = vpop.eup %1510  ;;  %v627_v30 = vmul.f32 %v1509_v28, %v1955_v8  ;;  %1522 = vrsqrt.f32 %v1990_v55 }
  0x50   :  { %v615_v33 = vmul.f32 %v1511_v29, %v1960_v13  ;;  %v1513_v45 = vpop.eup %1512  ;;  %1524 = vpow2.f32 %v1208_v63 }
  0x51   :  { %v628_v37 = vmul.f32 %v1509_v28, %v627_v30  ;;  %v603_v49 = vmul.f32 %v1513_v45, %v1966_v19  ;;  %v1515_v52 = vpop.eup %1514 }
  0x52   :  { %v616_v47 = vmul.f32 %v1511_v29, %v615_v33  ;;  %v1517_v57 = vpop.eup %1516  ;;  %v591_v60 = vmul.f32 %v1515_v52, %v1968_v20 }
  0x53   :  { %v629_v48 = vmul.f32 0.5, %v628_v37  ;;  %v604_v59 = vmul.f32 %v1513_v45, %v603_v49  ;;  %v1519_v3 = vpop.eup %1518  ;;  %v1229_v10 = vadd.f32 1.0, %v1517_v57 }
  0x54   :  { %v617_v53 = vmul.f32 0.5, %v616_v47  ;;  %v592_v6 = vmul.f32 %v1515_v52, %v591_v60  ;;  %v1228_v15 = vadd.f32 1.0, %v1519_v3  ;;  %v2009_v25 = vpop.eup %1520 }
  0x55   :  { %v630_v58 = vsub.f32 1.5, %v629_v48  ;;  %v605_v5 = vmul.f32 0.5, %v604_v59  ;;  %1526 = vlog2.f32 %v1229_v10  ;;  %v588_v59 = vand.u32 2147483648, %v1982_v39 }
  0x56   :  { %v618_v62 = vsub.f32 1.5, %v617_v53  ;;  %v593_v17 = vmul.f32 0.5, %v592_v6  ;;  %1528 = vlog2.f32 %v1228_v15 }
  0x57   :  { %v631_v4 = vmul.f32 %v1509_v28, %v630_v58  ;;  %v606_v16 = vsub.f32 1.5, %v605_v5  ;;  %v1178_v28 = vsub.f32 0.0, %v1162_v7  ;;  %1530 = vlog2.f32 %v391_v23 }
  0x58   :  { %v619_v11 = vmul.f32 %v1511_v29, %v618_v62  ;;  %v594_v31 = vsub.f32 1.5, %v593_v17  ;;  %v1149_v5 = vmax.f32 %v1957_v9, 0.0 }
  0x59   :  { %v632_v14 = vmul.f32 %v631_v4, %v1955_v8  ;;  %v607_v27 = vmul.f32 %v1513_v45, %v606_v16  ;;  %v600_v45 = vand.u32 2147483648, %v1968_v20  ;;  %v1206_v49 = vmul.f32 1.442695, %v1178_v28 }
  0x5a   :  { %v620_v21 = vmul.f32 %v619_v11, %v1960_v13  ;;  %v595_v53 = vmul.f32 %v1515_v52, %v594_v31 }
  0x5b   :  { %v634_v26 = vsel %vm633_vm0, %v1955_v8, %v632_v14  ;;  %v2029_v8 = vpop.eup %1522  ;;  %v608_v38 = vmul.f32 %v607_v27, %v1966_v19  ;;  %1532 = vpow2.f32 %v1206_v49 }
  0x5c   :  { %v2017_v29 = vsel %vm635_vm1, %v636_v46, %v634_v26  ;;  %v622_v30 = vsel %vm621_vm2, %v1960_v13, %v620_v21  ;;  %v579_v46 = vmul.f32 %v2009_v25, %v1982_v39  ;;  %v1525_v56 = vpop.eup %1524  ;;  %v567_v52 = vmul.f32 %v2029_v8, %v1990_v55 }
  0x5d   :  { %v653_v33 = vmul.f32 0.010328, %v2017_v29  ;;  %v717_v35 = vmul.f32 0.001308, %v2017_v29  ;;  %v2027_v36 = vsel %vm623_vm3, %v624_v54, %v622_v30  ;;  %v610_v13 = vsel %vm609_vm4, %v1966_v19, %v608_v38  ;;  %v1527_v60 = vpop.eup %1526 }
  0x5e   :  { %v716_v37 = vmul.f32 0.001308, %v2027_v36  ;;  %v652_v48 = vmul.f32 0.010328, %v2027_v36  ;;  %v182_v54 = vshrl.u32 %v2007_v24, 16  ;;  %v2046_v63 = vsel %vm611_vm5, %v612_v22, %v610_v13  ;;  %v1529_v3 = vpop.eup %1528 }
  0x5f   :  { %v733_v47 = vadd.f32 0.189269, %v717_v35  ;;  %v669_v57 = vadd.f32 0.802853, %v653_v33  ;;  %v580_v0 = vmul.f32 %v2009_v25, %v579_v46  ;;  %v651_v10 = vmul.f32 0.010328, %v2046_v63  ;;  %v2062_v26 = vpop.eup %1530 }
  0x60   :  { %v732_v50 = vadd.f32 0.189269, %v716_v37  ;;  %v668_v6 = vadd.f32 0.802853, %v652_v48  ;;  %v1227_v11 = vadd.f32 1.0, %v1525_v56  ;;  %v596_v14 = vmul.f32 %v595_v53, %v1968_v20 }
  0x61   :  { %v749_v58 = vmul.f32 %v733_v47, %v2017_v29  ;;  %v685_v19 = vmul.f32 %v669_v57, %v2017_v29  ;;  %v1261_v16 = vmul.f32 0.6931472, %v1527_v60  ;;  %v715_v17 = vmul.f32 0.001308, %v2046_v63  ;;  %v1533_v38 = vpop.eup %1532 }
  0x62   :  { %v748_v62 = vmul.f32 %v732_v50, %v2027_v36  ;;  %v1148_v22 = vmax.f32 %v1964_v18, 0.0  ;;  %v1259_v9 = vmul.f32 0.6931472, %v1529_v3  ;;  %v598_v23 = vsel %vm597_vm6, %v1968_v20, %v596_v14  ;;  %v2073_v18 = vld [vmem:[#allocation10 + $0x58] sm:$0xff] }
  0x63   :  { %v765_v4 = vadd.f32 1.432788, %v749_v58  ;;  %v684_v28 = vmul.f32 %v668_v6, %v2027_v36  ;;  %v731_v30 = vadd.f32 0.189269, %v715_v17  ;;  %v2069_v31 = vsel %vm599_vm7, %v600_v45, %v598_v23 }
  0x64   :  { %v764_v7 = vadd.f32 1.432788, %v748_v62  ;;  %v667_v35 = vadd.f32 0.802853, %v651_v10  ;;  %1534 = vlog2.f32 %v1227_v11  ;;  %v2076_v37 = vmul.f32 %v2029_v8, %v567_v52 }
  0x65   :  { %v781_v15 = vmul.f32 %v765_v4, %v2017_v29  ;;  %v2078_v46 = vadd.f32 2.515517, %v685_v19  ;;  %v2081_v47 = vadd.f32 %v1261_v16, %v1149_v5  ;;  %v714_v20 = vmul.f32 0.001308, %v2069_v31 }
  0x66   :  { %v780_v21 = vmul.f32 %v764_v7, %v2027_v36  ;;  %v2086_v48 = vadd.f32 %v1259_v9, %v1148_v22  ;;  %v581_v49 = vmul.f32 0.5, %v580_v0  ;;  %v2089_v13 = vadd.f32 2.515517, %v684_v28 }
  0x67   :  { %v2064_v27 = vadd.f32 1.0, %v781_v15  ;;  %v747_v53 = vmul.f32 %v731_v30, %v2046_v63  ;;  %v1161_v56 = vand.u32 2147483647, %v2073_v18  ;;  %v683_v58 = vmul.f32 %v667_v35, %v2046_v63 }
  0x68   :  { %v2071_v33 = vadd.f32 1.0, %v780_v21  ;;  %v1147_v60 = vmax.f32 %v1979_v34, 0.0  ;;  %v1226_v62 = vadd.f32 1.0, %v1533_v38  ;;  %v650_v52 = vmul.f32 0.010328, %v2069_v31 }
  0x69   :  { %1536 = vrcp.f32 %v2064_v27  ;;  %v1032_v45 = vand.u32 2147483647, %v2064_v27  ;;  %v1034_v50 = vand.u32 2147483648, %v2064_v27  ;;  %vm1028_vm9 = vweird.f32 %v2064_v27 }
  0x6a   :  { %1538 = vrcp.f32 %v2071_v33  ;;  %v1017_v57 = vand.u32 2147483647, %v2071_v33  ;;  %v763_v0 = vadd.f32 1.432788, %v747_v53  ;;  %v730_v3 = vadd.f32 0.189269, %v714_v20  ;;  %v1535_v4 = vpop.eup %1534 }
  0x6b   :  { %vm2099_vm10 = vcmp.eq.f32.partialorder %v1032_v45, 8.507059e+37  ;;  %vm1013_vm11 = vweird.f32 %v2071_v33  ;;  %v1019_v6 = vand.u32 2147483648, %v2071_v33  ;;  %v582_v7 = vsub.f32 1.5, %v581_v49 }
  0x6c   :  { %v1035_v11 = vor.u32 1.1754944e-38, %v1034_v50  ;;  %v779_v14 = vmul.f32 %v763_v0, %v2046_v63  ;;  %v746_v19 = vmul.f32 %v730_v3, %v2069_v31  ;;  %v1177_v15 = vsub.f32 0.0, %v1161_v56 }
  0x6d   :  { %vm2109_vm13 = vcmp.eq.f32.partialorder %v1017_v57, 8.507059e+37  ;;  %v2113_v22 = vadd.f32 2.515517, %v683_v58  ;;  %v583_v9 = vmul.f32 %v2009_v25, %v582_v7  ;;  %1540 = vlog2.f32 %v1226_v62 }
  0x6e   :  { %v2117_v28 = vadd.f32 1.0, %v779_v14  ;;  %v762_v35 = vadd.f32 1.432788, %v746_v19  ;;  %v1204_v20 = vmul.f32 1.442695, %v1177_v15  ;;  %vm1069_vm1 = vcmp.lt.f32.partialorder %v1931_v40, 0.5 }
  0x6f   :  { %v1537_v10 = vpop.eup %1536  ;;  %v584_v38 = vmul.f32 %v583_v9, %v1982_v39  ;;  %v666_v49 = vadd.f32 0.802853, %v650_v52  ;;  %v1020_v62 = vor.u32 1.1754944e-38, %v1019_v6  ;;  %v2132_v0 = vmul.f32 0.6931472, %v1535_v4 }
  0x70   :  { %v1539_v16 = vpop.eup %1538  ;;  %v1024_v17 = vmul.f32 %v1537_v10, %v2064_v27  ;;  %vm1029_vm14 = vweird.f32 %v1537_v10  ;;  %1542 = vrcp.f32 %v2117_v28  ;;  %v1002_v53 = vand.u32 2147483647, %v2117_v28 }
  0x71   :  { %v1009_v23 = vmul.f32 %v1539_v16, %v2071_v33  ;;  %vm1014_vm15 = vweird.f32 %v1539_v16  ;;  %v1004_v25 = vand.u32 2147483648, %v2117_v28  ;;  %v778_v56 = vmul.f32 %v762_v35, %v2069_v31  ;;  %vm2127_vm0 = vmor %vm1028_vm9, %vm1029_vm14 }
  0x72   :  { %v1025_v30 = vsub.f32 1.0, %v1024_v17  ;;  %1544 = vpow2.f32 %v1204_v20  ;;  %vm2136_vm2 = vmor %vm1013_vm11, %vm1014_vm15  ;;  %vm1068_vm3 = vcmp.lt.f32.partialorder %v1933_v41, 0.5  ;;  %v586_v7 = vsel %vm585_vm8, %v1982_v39, %v584_v38 }
  0x73   :  { %v1010_v45 = vsub.f32 1.0, %v1009_v23  ;;  %v2141_v27 = vadd.f32 1.0, %v778_v56  ;;  %v569_v6 = vmul.f32 0.5, %v2076_v37  ;;  %v2147_v4 = vpop.eup %1540  ;;  %vm998_vm4 = vweird.f32 %v2117_v28 }
  0x74   :  { %v1026_v50 = vmul.f32 %v1537_v10, %v1025_v30  ;;  %v2151_v33 = vmul.f32 %v666_v49, %v2069_v31  ;;  %v1146_v19 = vmax.f32 %v1994_v61, 0.0  ;;  %vm2156_vm5 = vcmp.eq.f32.partialorder %v1002_v53, 8.507059e+37 }
  0x75   :  { %v1011_v58 = vmul.f32 %v1539_v16, %v1010_v45  ;;  %v1005_v9 = vor.u32 1.1754944e-38, %v1004_v25  ;;  %1546 = vrcp.f32 %v2141_v27  ;;  %v989_v35 = vand.u32 2147483648, %v2141_v27 }
  0x76   :  { %v1027_v52 = vadd.f32 %v1537_v10, %v1026_v50  ;;  %v1543_v37 = vpop.eup %1542  ;;  %v570_v5 = vsub.f32 1.5, %v569_v6  ;;  %vm983_vm6 = vweird.f32 %v2141_v27  ;;  %vm573_vm7 = vcmp.eq.f32.partialorder %v1990_v55, inf  ;;  %v1117_v6 = vld [vmem:[#allocation8 + $0x78] sm:$0xff] }
  0x77   :  { %v1012_v14 = vadd.f32 %v1539_v16, %v1011_v58  ;;  %v994_v45 = vmul.f32 %v1543_v37, %v2117_v28  ;;  %vm999_vm8 = vweird.f32 %v1543_v37  ;;  %v987_v50 = vand.u32 2147483647, %v2141_v27 }
  0x78   :  { %v1031_v15 = vsel %vm2127_vm0, %v1537_v10, %v1027_v52  ;;  %v2170_v10 = vsel %vm587_vm12, %v588_v59, %v586_v7  ;;  %v990_v53 = vor.u32 1.1754944e-38, %v989_v35  ;;  %vm2187_vm9 = vmor %vm998_vm4, %vm999_vm8  ;;  %vm575_vm12 = vcmp.eq.f32.partialorder %v1990_v55, 0.0 }
  0x79   :  { %v1036_v23 = vsel %vm2099_vm10, %v1035_v11, %v1031_v15  ;;  %v1016_v30 = vsel %vm2136_vm2, %v1539_v16, %v1012_v14  ;;  %v1545_v11 = vpop.eup %1544  ;;  %v649_v16 = vmul.f32 0.010328, %v2170_v10  ;;  %v995_v59 = vsub.f32 1.0, %v994_v45 }
  0x7a   :  { %v1037_v38 = vmul.f32 %v1036_v23, %v2078_v46  ;;  %v1021_v20 = vsel %vm2109_vm13, %v1020_v62, %v1016_v30  ;;  %v713_v46 = vmul.f32 0.001308, %v2170_v10  ;;  %v1225_v25 = vadd.f32 1.0, %v1545_v11  ;;  %v1116_v23 = vld [vmem:[#allocation8 + $0x70] sm:$0xff] }
  0x7b   :  { %v1022_v49 = vmul.f32 %v1021_v20, %v2089_v13  ;;  %v1547_v56 = vpop.eup %1546  ;;  %v996_v57 = vmul.f32 %v1543_v37, %v995_v59  ;;  %v571_v62 = vmul.f32 %v2029_v8, %v570_v5  ;;  %vm1067_vm10 = vcmp.lt.f32.partialorder %v1935_v42, 0.5 }
  0x7c   :  { %v1053_v39 = vsub.f32 %v2017_v29, %v1037_v38  ;;  %v729_v58 = vadd.f32 0.189269, %v713_v46  ;;  %vm984_vm11 = vweird.f32 %v1547_v56  ;;  %v665_v3 = vadd.f32 0.802853, %v649_v16 }
  0x7d   :  { %v1052_v21 = vsub.f32 %v2027_v36, %v1022_v49  ;;  %v979_v36 = vmul.f32 %v1547_v56, %v2141_v27  ;;  %v997_v14 = vadd.f32 %v1543_v37, %v996_v57  ;;  %1548 = vlog2.f32 %v1225_v25  ;;  %vm2213_vm13 = vmor %vm983_vm6, %vm984_vm11 }
  0x7e   :  { %v1085_v13 = vsub.f32 0.0, %v1053_v39  ;;  %v745_v8 = vmul.f32 %v729_v58, %v2170_v10  ;;  %v572_v35 = vmul.f32 %v571_v62, %v1990_v55  ;;  %v576_v17 = vand.u32 2147483648, %v1990_v55  ;;  %v1115_v58 = vld [vmem:[#allocation8 + $0x68] sm:$0xff] }
  0x7f   :  { %v1084_v52 = vsub.f32 0.0, %v1052_v21  ;;  %v980_v30 = vsub.f32 1.0, %v979_v36  ;;  %v1001_v40 = vsel %vm2187_vm9, %v1543_v37, %v997_v14  ;;  %v698_v16 = vadd.f32 2.515517, %v2151_v33 }
  0x80   :  { %v1101_v7 = vsel %vm1069_vm1, %v1085_v13, %v1053_v39  ;;  %v761_v20 = vadd.f32 1.432788, %v745_v8  ;;  %v1006_v5 = vsel %vm2156_vm5, %v1005_v9, %v1001_v40  ;;  %v574_v41 = vsel %vm573_vm7, %v1990_v55, %v572_v35  ;;  %v2219_v9 = vld [vmem:[#allocation10 + $0x50] sm:$0xff] }
  0x81   :  { %v1293_v28 = vmul.f32 %v2081_v47, %v1101_v7  ;;  %v1100_v15 = vsel %vm1068_vm3, %v1084_v52, %v1052_v21  ;;  %v981_v47 = vmul.f32 %v1547_v56, %v980_v30  ;;  %v1007_v49 = vmul.f32 %v1006_v5, %v2113_v22  ;;  %v1114_v30 = vld [vmem:[#allocation8 + $0x60] sm:$0xff] }
  0x82   :  { %v1292_v38 = vmul.f32 %v2086_v48, %v1100_v15  ;;  %v777_v37 = vmul.f32 %v761_v20, %v2170_v10  ;;  %vm988_vm14 = vcmp.eq.f32.partialorder %v987_v50, 8.507059e+37  ;;  %v1255_v22 = vmul.f32 0.6931472, %v2147_v4 }
  0x83   :  { %v1309_v45 = vadd.f32 %v1293_v28, %v1117_v6  ;;  %v982_v39 = vadd.f32 %v1547_v56, %v981_v47  ;;  %v1549_v59 = vpop.eup %1548  ;;  %v1051_v27 = vsub.f32 %v2046_v63, %v1007_v49  ;;  %v1275_v46 = vadd.f32 %v2132_v0, %v1147_v60  ;;  %v2258_v28 = vld [vmem:[#allocation10 + $0x48] sm:$0xff] }
  0x84   :  { %v1308_v11 = vadd.f32 %v1292_v38, %v1116_v23  ;;  %v2227_v21 = vadd.f32 1.0, %v777_v37  ;;  %v2231_v25 = vsel %vm575_vm12, %v576_v17, %v574_v41  ;;  %v681_v50 = vmul.f32 %v665_v3, %v2170_v10 }
  0x85   :  { %1325 = vst [vmem:[#allocation12 + $0x78] sm:$0xff] %v1309_v45  ;;  %1328 = vmatpush.xpose.msra.mxu0 %v1309_v45  ;;  %v986_v33 = vsel %vm2213_vm13, %v1547_v56, %v982_v39  ;;  %v712_v4 = vmul.f32 0.001308, %v2231_v25  ;;  %v1160_v13 = vand.u32 2147483647, %v2219_v9  ;;  %v1083_v63 = vsub.f32 0.0, %v1051_v27 }
  0x86   :  { %1324 = vst [vmem:[#allocation12 + $0x70] sm:$0xff] %v1308_v11  ;;  %v991_v57 = vsel %vm988_vm14, %v990_v53, %v986_v33  ;;  %1550 = vrcp.f32 %v2227_v21  ;;  %v648_v34 = vmul.f32 0.010328, %v2231_v25  ;;  %vm1066_vm15 = vcmp.lt.f32.partialorder %v1937_v43, 0.5 }
  0x87   :  { %v992_v60 = vmul.f32 %v991_v57, %v698_v16  ;;  %v1274_v55 = vadd.f32 %v1255_v22, %v1146_v19  ;;  %v417_v0 = vmul.f32 0.6931472, %v2062_v26  ;;  %v1099_v56 = vsel %vm1067_vm10, %v1083_v63, %v1051_v27 }
  0x88   :  { %v1145_v62 = vmax.f32 %v2073_v18, 0.0  ;;  %v728_v53 = vadd.f32 0.189269, %v712_v4  ;;  %v198_v52 = vxor.u32 %v182_v54, %v2007_v24  ;;  %v1291_v29 = vmul.f32 %v1275_v46, %v1099_v56 }
  0x89   :  { %1329 = vmatpush.xpose.msra.mxu0 %v1308_v11  ;;  %v1050_v36 = vsub.f32 %v2069_v31, %v992_v60  ;;  %v2251_v3 = vadd.f32 2.515517, %v681_v50  ;;  %v92_v61 = vadd.s32 56, %v1904_v1  ;;  %v1253_v19 = vmul.f32 0.6931472, %v1549_v59 }
  0x8a   :  { %v664_v26 = vadd.f32 0.802853, %v648_v34  ;;  %v744_v42 = vmul.f32 %v728_v53, %v2231_v25  ;;  %v1176_v7 = vsub.f32 0.0, %v1160_v13  ;;  %v1307_v6 = vadd.f32 %v1291_v29, %v1115_v58 }
  0x8b   :  { %v1082_v14 = vsub.f32 0.0, %v1050_v36  ;;  %v972_v18 = vand.u32 2147483647, %v2227_v21  ;;  %v2256_v8 = vmul.f32 -2.0, %v417_v0  ;;  %vm968_vm0 = vweird.f32 %v2227_v21 }
  0x8c   :  { %v1551_v24 = vpop.eup %1550  ;;  %v760_v54 = vadd.f32 1.432788, %v744_v42  ;;  %v1202_v31 = vmul.f32 1.442695, %v1176_v7  ;;  %v214_v15 = vmul.u32 2146121005, %v198_v52  ;;  %v680_v20 = vmul.f32 %v664_v26, %v2231_v25 }
  0x8d   :  { %1323 = vst [vmem:[#allocation12 + $0x68] sm:$0xff] %v1307_v6  ;;  %1330 = vmatpush.xpose.msra.mxu0 %v1307_v6  ;;  %v1098_v23 = vsel %vm1066_vm15, %v1082_v14, %v1050_v36  ;;  %v964_v35 = vmul.f32 %v1551_v24, %v2227_v21  ;;  %v974_v38 = vand.u32 2147483648, %v2227_v21  ;;  %1552 = vrsqrt.f32 %v2256_v8 }
  0x8e   :  { %v1290_v40 = vmul.f32 %v1274_v55, %v1098_v23  ;;  %v776_v45 = vmul.f32 %v760_v54, %v2231_v25  ;;  %1554 = vpow2.f32 %v1202_v31  ;;  %vm969_vm1 = vweird.f32 %v1551_v24 }
  0x8f   :  { %v965_v5 = vsub.f32 1.0, %v964_v35  ;;  %v2268_v47 = vadd.f32 %v1253_v19, %v1145_v62  ;;  %v1159_v43 = vand.u32 2147483647, %v2258_v28  ;;  %v230_v49 = vshrl.u32 %v214_v15, 15  ;;  %vm2280_vm3 = vmor %vm968_vm0, %vm969_vm1 }
  0x90   :  { %v1306_v41 = vadd.f32 %v1290_v40, %v1114_v30  ;;  %v2271_v11 = vadd.f32 1.0, %v776_v45  ;;  %v131_v48 = vmul.u32 128, %v92_v61  ;;  %vm2273_vm2 = vcmp.eq.f32.partialorder %v972_v18, 8.507059e+37 }
  0x91   :  { %v966_v37 = vmul.f32 %v1551_v24, %v965_v5  ;;  %v975_v16 = vor.u32 1.1754944e-38, %v974_v38  ;;  %v91_v39 = vadd.s32 48, %v1904_v1  ;;  %vm1065_vm4 = vcmp.lt.f32.partialorder %v1939_v44, 0.5 }
  0x92   :  { %1322 = vst [vmem:[#allocation12 + $0x60] sm:$0xff] %v1306_v41  ;;  %1331 = vmatpush.xpose.msra.mxu0 %v1306_v41  ;;  %v2285_v59 = vadd.f32 2.515517, %v680_v20  ;;  %1556 = vrcp.f32 %v2271_v11  ;;  %v564_v27 = vand.u32 2147483648, %v2256_v8  ;;  %v1175_v46 = vsub.f32 0.0, %v1159_v43  ;;  %v1113_v41 = vld [vmem:[#allocation8 + $0x58] sm:$0xff] }
  0x93   :  { %v1553_v33 = vpop.eup %1552  ;;  %v967_v50 = vadd.f32 %v1551_v24, %v966_v37  ;;  %v246_v4 = vxor.u32 %v230_v49, %v214_v15  ;;  %v147_v13 = vadd.s32 %v131_v48, %v1906_v2  ;;  %v90_v21 = vadd.s32 40, %v1904_v1 }
  0x94   :  { %v1555_v63 = vpop.eup %1554  ;;  %vm953_vm5 = vweird.f32 %v2271_v11  ;;  %v957_v57 = vand.u32 2147483647, %v2271_v11  ;;  %v555_v34 = vmul.f32 %v1553_v33, %v2256_v8  ;;  %v130_v60 = vmul.u32 128, %v91_v39 }
  0x95   :  { %v971_v55 = vsel %vm2280_vm3, %v1551_v24, %v967_v50  ;;  %v959_v0 = vand.u32 2147483648, %v2271_v11  ;;  %v1224_v56 = vadd.f32 1.0, %v1555_v63  ;;  %vm561_vm6 = vcmp.eq.f32.partialorder %v2256_v8, inf }
  0x96   :  { %v262_v58 = vmul.u32 2221713035, %v246_v4  ;;  %v976_v62 = vsel %vm2273_vm2, %v975_v16, %v971_v55  ;;  %v556_v53 = vmul.f32 %v1553_v33, %v555_v34  ;;  %vm563_vm7 = vcmp.eq.f32.partialorder %v2256_v8, 0.0 }
  0x97   :  { %v165_v52 = vxor.u32 %v1913_v12, %v147_v13  ;;  %v146_v29 = vadd.s32 %v130_v60, %v1906_v2  ;;  %v977_v36 = vmul.f32 %v976_v62, %v2251_v3  ;;  %v1200_v61 = vmul.f32 1.442695, %v1175_v46 }
  0x98   :  { %v278_v19 = vshrl.u32 %v262_v58, 16  ;;  %v129_v26 = vmul.u32 128, %v90_v21  ;;  %v1557_v42 = vpop.eup %1556  ;;  %vm2304_vm8 = vcmp.eq.f32.partialorder %v957_v57, 8.507059e+37  ;;  %v557_v6 = vmul.f32 0.5, %v556_v53 }
  0x99   :  { %v181_v14 = vshrl.u32 %v165_v52, 16  ;;  %v164_v18 = vxor.u32 %v1913_v12, %v146_v29  ;;  %v1049_v24 = vsub.f32 %v2170_v10, %v977_v36  ;;  %v949_v54 = vmul.f32 %v1557_v42, %v2271_v11 }
  0x9a   :  { %1558 = vlog2.f32 %v1224_v56  ;;  %v294_v31 = vxor.u32 %v278_v19, %v262_v58  ;;  %v558_v15 = vsub.f32 1.5, %v557_v6  ;;  %v145_v30 = vadd.s32 %v129_v26, %v1906_v2 }
  0x9b   :  { %v197_v3 = vxor.u32 %v181_v14, %v165_v52  ;;  %v180_v23 = vshrl.u32 %v164_v18, 16  ;;  %v1081_v35 = vsub.f32 0.0, %v1049_v24  ;;  %v950_v38 = vsub.f32 1.0, %v949_v54 }
  0x9c   :  { %vm954_vm9 = vweird.f32 %v1557_v42  ;;  %v310_v40 = vshrl.u32 %v294_v31, 8  ;;  %v559_v20 = vmul.f32 %v1553_v33, %v558_v15  ;;  %v89_v43 = vadd.s32 32, %v1904_v1 }
  0x9d   :  { %v213_v45 = vmul.u32 2146121005, %v197_v3  ;;  %v196_v5 = vxor.u32 %v180_v23, %v164_v18  ;;  %v1097_v10 = vsel %vm1065_vm4, %v1081_v35, %v1049_v24  ;;  %v951_v49 = vmul.f32 %v1557_v42, %v950_v38  ;;  %vm2319_vm10 = vmor %vm953_vm5, %vm954_vm9 }
  0x9e   :  { %v326_v48 = vcvt.s32.f32 %v310_v40  ;;  %v163_v37 = vxor.u32 %v1913_v12, %v145_v30  ;;  %v1289_v17 = vmul.f32 %v2268_v47, %v1097_v10  ;;  %v960_v39 = vor.u32 1.1754944e-38, %v959_v0 }
  0x9f   :  { %v560_v22 = vmul.f32 %v559_v20, %v2256_v8  ;;  %1560 = vpow2.f32 %v1200_v61  ;;  %v952_v44 = vadd.f32 %v1557_v42, %v951_v49  ;;  %v229_v50 = vshrl.u32 %v213_v45, 15 }
  0xa0   :  { %v1559_v46 = vpop.eup %1558  ;;  %v342_v33 = vmul.f32 5.9604645e-08, %v326_v48  ;;  %v212_v4 = vmul.u32 2146121005, %v196_v5  ;;  %v1305_v13 = vadd.f32 %v1289_v17, %v1113_v41  ;;  %v179_v21 = vshrl.u32 %v163_v37, 16 }
  0xa1   :  { %v562_v47 = vsel %vm561_vm6, %v2256_v8, %v560_v22  ;;  %v128_v11 = vmul.u32 128, %v89_v43  ;;  %v956_v63 = vsel %vm2319_vm10, %v1557_v42, %v952_v44  ;;  %v1144_v55 = vmax.f32 %v2219_v9, 0.0 }
  0xa2   :  { %v2333_v57 = vsel %vm563_vm7, %v564_v27, %v562_v47  ;;  %v2335_v34 = vadd.f32 2.9802322e-08, %v342_v33  ;;  %1321 = vst [vmem:[#allocation12 + $0x58] sm:$0xff] %v1305_v13  ;;  %1332 = vmatpush.xpose.msra.mxu0 %v1305_v13  ;;  %v961_v60 = vsel %vm2304_vm8, %v960_v39, %v956_v63  ;;  %v1251_v0 = vmul.f32 0.6931472, %v1559_v46 }
  0xa3   :  { %v711_v56 = vmul.f32 0.001308, %v2333_v57  ;;  %v962_v58 = vmul.f32 %v961_v60, %v2285_v59  ;;  %v245_v53 = vxor.u32 %v229_v50, %v213_v45  ;;  %v228_v8 = vshrl.u32 %v212_v4, 15 }
  0xa4   :  { %v374_v62 = vsub.f32 1.0, %v2335_v34  ;;  %v195_v29 = vxor.u32 %v179_v21, %v163_v37  ;;  %v144_v36 = vadd.s32 %v128_v11, %v1906_v2  ;;  %vm1064_vm11 = vcmp.lt.f32.partialorder %v1945_v51, 0.5  ;;  %v1112_v51 = vld [vmem:[#allocation8 + $0x50] sm:$0xff]  ;;  %v2359_v21 = vld [vmem:[#allocation10 + $0x40] sm:$0xff] }
  0xa5   :  { %v1561_v27 = vpop.eup %1560  ;;  %v727_v52 = vadd.f32 0.189269, %v711_v56  ;;  %v1048_v61 = vsub.f32 %v2231_v25, %v962_v58  ;;  %v261_v19 = vmul.u32 2221713035, %v245_v53  ;;  %v1272_v26 = vadd.f32 %v1251_v0, %v1144_v55 }
  0xa6   :  { %v390_v9 = vmin.f32 %v2335_v34, %v374_v62  ;;  %v244_v59 = vxor.u32 %v228_v8, %v212_v4  ;;  %v211_v7 = vmul.u32 2146121005, %v195_v29  ;;  %v1223_v14 = vadd.f32 1.0, %v1561_v27 }
  0xa7   :  { %v743_v42 = vmul.f32 %v727_v52, %v2333_v57  ;;  %v1080_v6 = vsub.f32 0.0, %v1048_v61  ;;  %v277_v18 = vshrl.u32 %v261_v19, 16  ;;  %v647_v24 = vmul.f32 0.010328, %v2333_v57 }
  0xa8   :  { %1562 = vlog2.f32 %v390_v9  ;;  %v260_v31 = vmul.u32 2221713035, %v244_v59  ;;  %v162_v25 = vxor.u32 %v1913_v12, %v144_v36  ;;  %v227_v23 = vshrl.u32 %v211_v7, 15 }
  0xa9   :  { %v759_v54 = vadd.f32 1.432788, %v743_v42  ;;  %v1096_v15 = vsel %vm1064_vm11, %v1080_v6, %v1048_v61  ;;  %v293_v3 = vxor.u32 %v277_v18, %v261_v19  ;;  %v88_v30 = vadd.s32 24, %v1904_v1 }
  0xaa   :  { %v1288_v35 = vmul.f32 %v1272_v26, %v1096_v15  ;;  %v276_v40 = vshrl.u32 %v260_v31, 16  ;;  %v178_v20 = vshrl.u32 %v162_v25, 16  ;;  %v243_v5 = vxor.u32 %v227_v23, %v211_v7 }
  0xab   :  { %v775_v38 = vmul.f32 %v759_v54, %v2333_v57  ;;  %v309_v45 = vshrl.u32 %v293_v3, 8  ;;  %v127_v43 = vmul.u32 128, %v88_v30  ;;  %1564 = vlog2.f32 %v1223_v14 }
  0xac   :  { %v1304_v10 = vadd.f32 %v1288_v35, %v1112_v51  ;;  %v292_v49 = vxor.u32 %v276_v40, %v260_v31  ;;  %v194_v48 = vxor.u32 %v178_v20, %v162_v25  ;;  %v259_v16 = vmul.u32 2221713035, %v243_v5 }
  0xad   :  { %v2352_v41 = vadd.f32 1.0, %v775_v38  ;;  %v325_v17 = vcvt.s32.f32 %v309_v45  ;;  %v143_v39 = vadd.s32 %v127_v43, %v1906_v2  ;;  %v663_v22 = vadd.f32 0.802853, %v647_v24 }
  0xae   :  { %v1563_v37 = vpop.eup %1562  ;;  %1320 = vst [vmem:[#allocation12 + $0x50] sm:$0xff] %v1304_v10  ;;  %1333 = vmatpush.xpose.msra.mxu0 %v1304_v10  ;;  %v308_v33 = vshrl.u32 %v292_v49, 8  ;;  %v275_v50 = vshrl.u32 %v259_v16, 16  ;;  %v210_v4 = vmul.u32 2146121005, %v194_v48  ;;  %v1143_v53 = vmax.f32 %v2258_v28, 0.0 }
  0xaf   :  { %1566 = vrcp.f32 %v2352_v41  ;;  %v415_v46 = vmul.f32 0.6931472, %v1563_v37  ;;  %v341_v44 = vmul.f32 5.9604645e-08, %v325_v17  ;;  %v161_v13 = vxor.u32 %v1913_v12, %v143_v39 }
  0xb0   :  { %v324_v63 = vcvt.s32.f32 %v308_v33  ;;  %v291_v60 = vxor.u32 %v275_v50, %v259_v16  ;;  %v1158_v55 = vand.u32 2147483647, %v2359_v21  ;;  %v226_v0 = vshrl.u32 %v210_v4, 15 }
  0xb1   :  { %v2357_v47 = vmul.f32 -2.0, %v415_v46  ;;  %v2361_v11 = vadd.f32 2.9802322e-08, %v341_v44  ;;  %v177_v56 = vshrl.u32 %v161_v13, 16  ;;  %v1565_v58 = vpop.eup %1564  ;;  %v679_v62 = vmul.f32 %v663_v22, %v2333_v57 }
  0xb2   :  { %vm938_vm12 = vweird.f32 %v2352_v41  ;;  %v340_v52 = vmul.f32 5.9604645e-08, %v324_v63  ;;  %v307_v29 = vshrl.u32 %v291_v60, 8  ;;  %v944_v61 = vand.u32 2147483648, %v2352_v41 }
  0xb3   :  { %1568 = vrsqrt.f32 %v2357_v47  ;;  %v373_v27 = vsub.f32 1.0, %v2361_v11  ;;  %v242_v9 = vxor.u32 %v226_v0, %v210_v4  ;;  %v193_v19 = vxor.u32 %v177_v56, %v161_v13 }
  0xb4   :  { %v1174_v26 = vsub.f32 0.0, %v1158_v55  ;;  %v2372_v59 = vadd.f32 2.9802322e-08, %v340_v52  ;;  %v323_v28 = vcvt.s32.f32 %v307_v29  ;;  %v942_v6 = vand.u32 2147483647, %v2352_v41 }
  0xb5   :  { %v1567_v8 = vpop.eup %1566  ;;  %v389_v42 = vmin.f32 %v2361_v11, %v373_v27  ;;  %v258_v14 = vmul.u32 2221713035, %v242_v9  ;;  %v1249_v18 = vmul.f32 0.6931472, %v1565_v58  ;;  %v209_v31 = vmul.u32 2146121005, %v193_v19 }
  0xb6   :  { %v934_v36 = vmul.f32 %v1567_v8, %v2352_v41  ;;  %vm939_vm13 = vweird.f32 %v1567_v8  ;;  %v372_v24 = vsub.f32 1.0, %v2372_v59  ;;  %v339_v54 = vmul.f32 5.9604645e-08, %v323_v28  ;;  %v1111_v19 = vld [vmem:[#allocation8 + $0x48] sm:$0xff] }
  0xb7   :  { %v945_v51 = vor.u32 1.1754944e-38, %v944_v61  ;;  %1570 = vlog2.f32 %v389_v42  ;;  %v274_v3 = vshrl.u32 %v258_v14, 16  ;;  %vm2378_vm14 = vmor %vm938_vm12, %vm939_vm13  ;;  %v1198_v35 = vmul.f32 1.442695, %v1174_v26 }
  0xb8   :  { %v935_v7 = vsub.f32 1.0, %v934_v36  ;;  %v388_v38 = vmin.f32 %v2372_v59, %v372_v24  ;;  %v2384_v40 = vadd.f32 2.9802322e-08, %v339_v54  ;;  %v695_v20 = vadd.f32 2.515517, %v679_v62 }
  0xb9   :  { %v1569_v25 = vpop.eup %1568  ;;  %vm943_vm15 = vcmp.eq.f32.partialorder %v942_v6, 8.507059e+37  ;;  %v290_v5 = vxor.u32 %v274_v3, %v258_v14  ;;  %v225_v41 = vshrl.u32 %v209_v31, 15  ;;  %v87_v37 = vadd.s32 16, %v1904_v1 }
  0xba   :  { %v936_v15 = vmul.f32 %v1567_v8, %v935_v7  ;;  %v543_v30 = vmul.f32 %v1569_v25, %v2357_v47  ;;  %1572 = vlog2.f32 %v388_v38  ;;  %v371_v10 = vsub.f32 1.0, %v2384_v40 }
  0xbb   :  { %v306_v48 = vshrl.u32 %v290_v5, 8  ;;  %1574 = vpow2.f32 %v1198_v35  ;;  %vm1063_vm0 = vcmp.lt.f32.partialorder %v1975_v32, 0.5  ;;  %v1271_v33 = vadd.f32 %v1249_v18, %v1143_v53 }
  0xbc   :  { %v937_v45 = vadd.f32 %v1567_v8, %v936_v15  ;;  %v544_v43 = vmul.f32 %v1569_v25, %v543_v30  ;;  %v387_v39 = vmin.f32 %v2384_v40, %v371_v10  ;;  %v241_v13 = vxor.u32 %v225_v41, %v209_v31  ;;  %v2418_v15 = vld [vmem:[#allocation10 + $0x30] sm:$0xff] }
  0xbd   :  { %v1571_v22 = vpop.eup %1570  ;;  %v322_v44 = vcvt.s32.f32 %v306_v48  ;;  %vm549_vm1 = vcmp.eq.f32.partialorder %v2357_v47, inf  ;;  %v126_v55 = vmul.u32 128, %v87_v37  ;;  %v552_v58 = vand.u32 2147483648, %v2357_v47 }
  0xbe   :  { %v941_v49 = vsel %vm2378_vm14, %v1567_v8, %v937_v45  ;;  %v545_v16 = vmul.f32 0.5, %v544_v43  ;;  %v413_v4 = vmul.f32 0.6931472, %v1571_v22  ;;  %v2397_v8 = vld [vmem:[#allocation10 + $0x38] sm:$0xff]  ;;  %1576 = vlog2.f32 %v387_v39 }
  0xbf   :  { %v946_v17 = vsel %vm943_vm15, %v945_v51, %v941_v49  ;;  %v338_v60 = vmul.f32 5.9604645e-08, %v322_v44  ;;  %v1157_v53 = vand.u32 2147483647, %v2397_v8  ;;  %vm551_vm2 = vcmp.eq.f32.partialorder %v2357_v47, 0.0 }
  0xc0   :  { %v947_v46 = vmul.f32 %v946_v17, %v695_v20  ;;  %v546_v50 = vsub.f32 1.5, %v545_v16  ;;  %v1573_v0 = vpop.eup %1572  ;;  %v2395_v62 = vmul.f32 -2.0, %v413_v4  ;;  %v257_v61 = vmul.u32 2221713035, %v241_v13 }
  0xc1   :  { %v411_v52 = vmul.f32 0.6931472, %v1573_v0  ;;  %v2400_v29 = vadd.f32 2.9802322e-08, %v338_v60  ;;  %v1173_v26 = vsub.f32 0.0, %v1157_v53  ;;  %v142_v28 = vadd.s32 %v126_v55, %v1906_v2 }
  0xc2   :  { %v1047_v63 = vsub.f32 %v2333_v57, %v947_v46  ;;  %v547_v56 = vmul.f32 %v1569_v25, %v546_v50  ;;  %v1575_v57 = vpop.eup %1574  ;;  %1578 = vrsqrt.f32 %v2395_v62  ;;  %v273_v51 = vshrl.u32 %v257_v61, 16  ;;  %v2431_v50 = vld [vmem:[#allocation10 + $0x28] sm:$0xff] }
  0xc3   :  { %v2407_v42 = vmul.f32 -2.0, %v411_v52  ;;  %v370_v14 = vsub.f32 1.0, %v2400_v29  ;;  %v1222_v24 = vadd.f32 1.0, %v1575_v57  ;;  %v1196_v25 = vmul.f32 1.442695, %v1173_v26 }
  0xc4   :  { %v1079_v27 = vsub.f32 0.0, %v1047_v63  ;;  %v548_v36 = vmul.f32 %v547_v56, %v2357_v47  ;;  %v1577_v32 = vpop.eup %1576  ;;  %v160_v3 = vxor.u32 %v1913_v12, %v142_v28  ;;  %v1156_v38 = vand.u32 2147483647, %v2418_v15 }
  0xc5   :  { %1580 = vrsqrt.f32 %v2407_v42  ;;  %v386_v30 = vmin.f32 %v2400_v29, %v370_v14  ;;  %v409_v20 = vmul.f32 0.6931472, %v1577_v32  ;;  %v289_v43 = vxor.u32 %v273_v51, %v257_v61 }
  0xc6   :  { %v1095_v9 = vsel %vm1063_vm0, %v1079_v27, %v1047_v63  ;;  %v550_v6 = vsel %vm549_vm1, %v2357_v47, %v548_v36  ;;  %1582 = vlog2.f32 %v1222_v24  ;;  %v1172_v49 = vsub.f32 0.0, %v1156_v38 }
  0xc7   :  { %v1287_v7 = vmul.f32 %v1271_v33, %v1095_v9  ;;  %v2414_v18 = vsel %vm551_vm2, %v552_v58, %v550_v6  ;;  %1584 = vpow2.f32 %v1196_v25  ;;  %v2426_v48 = vmul.f32 -2.0, %v409_v20 }
  0xc8   :  { %v710_v31 = vmul.f32 0.001308, %v2414_v18  ;;  %v1579_v23 = vpop.eup %1578  ;;  %v646_v45 = vmul.f32 0.010328, %v2414_v18  ;;  %v176_v37 = vshrl.u32 %v160_v3, 16  ;;  %1586 = vlog2.f32 %v386_v30 }
  0xc9   :  { %v1303_v54 = vadd.f32 %v1287_v7, %v1111_v19  ;;  %v531_v35 = vmul.f32 %v1579_v23, %v2395_v62  ;;  %v1194_v22 = vmul.f32 1.442695, %v1172_v49  ;;  %1588 = vrsqrt.f32 %v2426_v48 }
  0xca   :  { %v726_v47 = vadd.f32 0.189269, %v710_v31  ;;  %v662_v46 = vadd.f32 0.802853, %v646_v45  ;;  %v305_v4 = vshrl.u32 %v289_v43, 8  ;;  %vm537_vm3 = vcmp.eq.f32.partialorder %v2395_v62, inf }
  0xcb   :  { %1319 = vst [vmem:[#allocation12 + $0x48] sm:$0xff] %v1303_v54  ;;  %1334 = vmatpush.xpose.msra.mxu0 %v1303_v54  ;;  %v1581_v10 = vpop.eup %1580  ;;  %v532_v41 = vmul.f32 %v1579_v23, %v531_v35  ;;  %v1155_v60 = vand.u32 2147483647, %v2431_v50  ;;  %v2435_v55 = vxor.u32 %v176_v37, %v160_v3  ;;  %vm539_vm4 = vcmp.eq.f32.partialorder %v2395_v62, 0.0 }
  0xcc   :  { %v742_v5 = vmul.f32 %v726_v47, %v2414_v18  ;;  %v519_v16 = vmul.f32 %v1581_v10, %v2407_v42  ;;  %v1583_v13 = vpop.eup %1582  ;;  %v540_v58 = vand.u32 2147483648, %v2395_v62  ;;  %v1142_v53 = vmax.f32 %v2359_v21, 0.0 }
  0xcd   :  { %v533_v39 = vmul.f32 0.5, %v532_v41  ;;  %v1585_v0 = vpop.eup %1584  ;;  %1590 = vpow2.f32 %v1194_v22  ;;  %v1171_v57 = vsub.f32 0.0, %v1155_v60  ;;  %v678_v61 = vmul.f32 %v662_v46, %v2414_v18 }
  0xce   :  { %v758_v17 = vadd.f32 1.432788, %v742_v5  ;;  %v520_v33 = vmul.f32 %v1581_v10, %v519_v16  ;;  %v1587_v36 = vpop.eup %1586  ;;  %v2444_v9 = vmul.f32 0.6931472, %v1583_v13  ;;  %v321_v19 = vcvt.s32.f32 %v305_v4 }
  0xcf   :  { %v534_v63 = vsub.f32 1.5, %v533_v39  ;;  %v1589_v26 = vpop.eup %1588  ;;  %v1221_v7 = vadd.f32 1.0, %v1585_v0  ;;  %vm525_vm5 = vcmp.eq.f32.partialorder %v2407_v42, inf  ;;  %vm527_vm6 = vcmp.eq.f32.partialorder %v2407_v42, 0.0 }
  0xd0   :  { %v774_v44 = vmul.f32 %v758_v17, %v2414_v18  ;;  %v521_v27 = vmul.f32 0.5, %v520_v33  ;;  %v528_v14 = vand.u32 2147483648, %v2407_v42  ;;  %v507_v24 = vmul.f32 %v1589_v26, %v2426_v48 }
  0xd1   :  { %v535_v52 = vmul.f32 %v1579_v23, %v534_v63  ;;  %v208_v32 = vmul.u32 2146121005, %v2435_v55  ;;  %v1192_v25 = vmul.f32 1.442695, %v1171_v57  ;;  %v407_v51 = vmul.f32 0.6931472, %v1587_v36 }
  0xd2   :  { %v2437_v56 = vadd.f32 1.0, %v774_v44  ;;  %v522_v6 = vsub.f32 1.5, %v521_v27  ;;  %v694_v3 = vadd.f32 2.515517, %v678_v61  ;;  %v508_v47 = vmul.f32 %v1589_v26, %v507_v24 }
  0xd3   :  { %v536_v28 = vmul.f32 %v535_v52, %v2395_v62  ;;  %v337_v30 = vmul.f32 5.9604645e-08, %v321_v19  ;;  %v1591_v35 = vpop.eup %1590  ;;  %vm513_vm7 = vcmp.eq.f32.partialorder %v2426_v48, inf  ;;  %v2466_v49 = vmul.f32 -2.0, %v407_v51 }
  0xd4   :  { %1592 = vrcp.f32 %v2437_v56  ;;  %v523_v31 = vmul.f32 %v1581_v10, %v522_v6  ;;  %vm923_vm8 = vweird.f32 %v2437_v56  ;;  %v927_v5 = vand.u32 2147483647, %v2437_v56 }
  0xd5   :  { %v538_v54 = vsel %vm537_vm3, %v2395_v62, %v536_v28  ;;  %1594 = vlog2.f32 %v1221_v7  ;;  %v929_v43 = vand.u32 2147483648, %v2437_v56  ;;  %v509_v62 = vmul.f32 0.5, %v508_v47 }
  0xd6   :  { %v2457_v23 = vsel %vm539_vm4, %v540_v58, %v538_v54  ;;  %v524_v20 = vmul.f32 %v523_v31, %v2407_v42  ;;  %1596 = vpow2.f32 %v1192_v25  ;;  %v1220_v16 = vadd.f32 1.0, %v1591_v35 }
  0xd7   :  { %v709_v38 = vmul.f32 0.001308, %v2457_v23  ;;  %v645_v37 = vmul.f32 0.010328, %v2457_v23  ;;  %v510_v39 = vsub.f32 1.5, %v509_v62  ;;  %vm515_vm10 = vcmp.eq.f32.partialorder %v2426_v48, 0.0 }
  0xd8   :  { %v526_v17 = vsel %vm525_vm5, %v2407_v42, %v524_v20  ;;  %v516_v13 = vand.u32 2147483648, %v2426_v48  ;;  %v930_v0 = vor.u32 1.1754944e-38, %v929_v43  ;;  %v2480_v27 = vadd.f32 2.9802322e-08, %v337_v30 }
  0xd9   :  { %v725_v41 = vadd.f32 0.189269, %v709_v38  ;;  %v2475_v44 = vsel %vm527_vm6, %v528_v14, %v526_v17  ;;  %v511_v4 = vmul.f32 %v1589_v26, %v510_v39  ;;  %v661_v42 = vadd.f32 0.802853, %v645_v37 }
  0xda   :  { %v1593_v45 = vpop.eup %1592  ;;  %v708_v33 = vmul.f32 0.001308, %v2475_v44  ;;  %1598 = vrsqrt.f32 %v2466_v49  ;;  %vm928_vm12 = vcmp.eq.f32.partialorder %v927_v5, 8.507059e+37  ;;  %v1141_v28 = vmax.f32 %v2397_v8, 0.0 }
  0xdb   :  { %v919_v10 = vmul.f32 %v1593_v45, %v2437_v56  ;;  %vm924_vm9 = vweird.f32 %v1593_v45  ;;  %v741_v46 = vmul.f32 %v725_v41, %v2457_v23  ;;  %v1595_v63 = vpop.eup %1594  ;;  %v512_v36 = vmul.f32 %v511_v4, %v2426_v48 }
  0xdc   :  { %vm2484_vm11 = vmor %vm923_vm8, %vm924_vm9  ;;  %v724_v57 = vadd.f32 0.189269, %v708_v33  ;;  %v1597_v61 = vpop.eup %1596  ;;  %1600 = vlog2.f32 %v1220_v16  ;;  %v644_v56 = vmul.f32 0.010328, %v2475_v44  ;;  %v1245_v54 = vmul.f32 0.6931472, %v1595_v63 }
  0xdd   :  { %v920_v22 = vsub.f32 1.0, %v919_v10  ;;  %v757_v58 = vadd.f32 1.432788, %v741_v46  ;;  %v514_v6 = vsel %vm513_vm7, %v2426_v48, %v512_v36  ;;  %v677_v8 = vmul.f32 %v661_v42, %v2457_v23  ;;  %v2529_v16 = vld [vmem:[#allocation10 + $0x20] sm:$0xff] }
  0xde   :  { %v740_v7 = vmul.f32 %v724_v57, %v2475_v44  ;;  %v2503_v31 = vsel %vm515_vm10, %v516_v13, %v514_v6  ;;  %vm1062_vm13 = vcmp.lt.f32.partialorder %v2335_v34, 0.5  ;;  %v1219_v30 = vadd.f32 1.0, %v1597_v61  ;;  %v1110_v13 = vld [vmem:[#allocation8 + $0x40] sm:$0xff] }
  0xdf   :  { %v921_v60 = vmul.f32 %v1593_v45, %v920_v22  ;;  %v773_v26 = vmul.f32 %v757_v58, %v2457_v23  ;;  %v1270_v38 = vadd.f32 %v2444_v9, %v1142_v53  ;;  %v660_v20 = vadd.f32 0.802853, %v644_v56 }
  0xe0   :  { %v756_v51 = vadd.f32 1.432788, %v740_v7  ;;  %v2508_v35 = vpop.eup %1598  ;;  %v369_v62 = vsub.f32 1.0, %v2480_v27  ;;  %v224_v10 = vshrl.u32 %v208_v32, 15  ;;  %v2521_v41 = vadd.f32 2.515517, %v677_v8 }
  0xe1   :  { %v922_v19 = vadd.f32 %v1593_v45, %v921_v60  ;;  %v2499_v24 = vadd.f32 1.0, %v773_v26  ;;  %v1140_v53 = vmax.f32 %v2418_v15, 0.0  ;;  %v643_v17 = vmul.f32 0.010328, %v2503_v31 }
  0xe2   :  { %v772_v48 = vmul.f32 %v756_v51, %v2475_v44  ;;  %v1601_v5 = vpop.eup %1600  ;;  %v676_v39 = vmul.f32 %v660_v20, %v2475_v44  ;;  %v504_v46 = vand.u32 2147483648, %v2466_v49  ;;  %v1154_v42 = vand.u32 2147483647, %v2529_v16 }
  0xe3   :  { %v926_v14 = vsel %vm2484_vm11, %v1593_v45, %v922_v19  ;;  %1602 = vrcp.f32 %v2499_v24  ;;  %v707_v45 = vmul.f32 0.001308, %v2503_v31  ;;  %v1243_v22 = vmul.f32 0.6931472, %v1601_v5 }
  0xe4   :  { %v931_v25 = vsel %vm928_vm12, %v930_v0, %v926_v14  ;;  %v2523_v21 = vadd.f32 1.0, %v772_v48  ;;  %1604 = vlog2.f32 %v1219_v30  ;;  %v912_v63 = vand.u32 2147483647, %v2499_v24 }
  0xe5   :  { %v932_v47 = vmul.f32 %v931_v25, %v694_v3  ;;  %v2516_v3 = vadd.f32 %v1245_v54, %v1141_v28  ;;  %v723_v9 = vadd.f32 0.189269, %v707_v45  ;;  %v914_v60 = vand.u32 2147483648, %v2499_v24 }
  0xe6   :  { %1606 = vrcp.f32 %v2523_v21  ;;  %vm908_vm14 = vweird.f32 %v2499_v24  ;;  %v659_v57 = vadd.f32 0.802853, %v643_v17  ;;  %vm501_vm0 = vcmp.eq.f32.partialorder %v2466_v49, inf }
  0xe7   :  { %v1046_v43 = vsub.f32 %v2414_v18, %v932_v47  ;;  %v495_v18 = vmul.f32 %v2508_v35, %v2466_v49  ;;  %v739_v0 = vmul.f32 %v723_v9, %v2503_v31  ;;  %vm503_vm1 = vcmp.eq.f32.partialorder %v2466_v49, 0.0 }
  0xe8   :  { %v385_v26 = vmin.f32 %v2480_v27, %v369_v62  ;;  %v240_v28 = vxor.u32 %v224_v10, %v208_v32  ;;  %vm2550_vm2 = vcmp.eq.f32.partialorder %v912_v63, 8.507059e+37  ;;  %v915_v6 = vor.u32 1.1754944e-38, %v914_v60 }
  0xe9   :  { %v1078_v37 = vsub.f32 0.0, %v1046_v43  ;;  %v1603_v33 = vpop.eup %1602  ;;  %v755_v36 = vadd.f32 1.432788, %v739_v0  ;;  %v496_v34 = vmul.f32 %v2508_v35, %v495_v18  ;;  %v1170_v51 = vsub.f32 0.0, %v1154_v42 }
  0xea   :  { %v904_v52 = vmul.f32 %v1603_v33, %v2499_v24  ;;  %vm909_vm15 = vweird.f32 %v1603_v33  ;;  %v2548_v56 = vpop.eup %1604  ;;  %1608 = vlog2.f32 %v385_v26  ;;  %v256_v47 = vmul.u32 2221713035, %v240_v28 }
  0xeb   :  { %v1094_v4 = vsel %vm1062_vm13, %v1078_v37, %v1046_v43  ;;  %v771_v14 = vmul.f32 %v755_v36, %v2503_v31  ;;  %v497_v54 = vmul.f32 0.5, %v496_v34  ;;  %vm2558_vm3 = vmor %vm908_vm14, %vm909_vm15  ;;  %vm1061_vm4 = vcmp.lt.f32.partialorder %v2361_v11, 0.5 }
  0xec   :  { %v1286_v58 = vmul.f32 %v1270_v38, %v1094_v4  ;;  %v905_v19 = vsub.f32 1.0, %v904_v52  ;;  %v1607_v25 = vpop.eup %1606  ;;  %v86_v20 = vadd.s32 8, %v1904_v1  ;;  %vm893_vm5 = vweird.f32 %v2523_v21 }
  0xed   :  { %v889_v32 = vmul.f32 %v1607_v25, %v2523_v21  ;;  %v2564_v30 = vadd.f32 1.0, %v771_v14  ;;  %v498_v38 = vsub.f32 1.5, %v497_v54  ;;  %v899_v45 = vand.u32 2147483648, %v2523_v21 }
  0xee   :  { %v1302_v61 = vadd.f32 %v1286_v58, %v1110_v13  ;;  %v906_v8 = vmul.f32 %v1603_v33, %v905_v19  ;;  %v272_v5 = vshrl.u32 %v256_v47, 16  ;;  %vm894_vm6 = vweird.f32 %v1607_v25 }
  0xef   :  { %v890_v24 = vsub.f32 1.0, %v889_v32  ;;  %v897_v43 = vand.u32 2147483647, %v2523_v21  ;;  %1610 = vrcp.f32 %v2564_v30  ;;  %v499_v10 = vmul.f32 %v2508_v35, %v498_v38  ;;  %vm2581_vm7 = vmor %vm893_vm5, %vm894_vm6 }
  0xf0   :  { %1318 = vst [vmem:[#allocation12 + $0x40] sm:$0xff] %v1302_v61  ;;  %1335 = vmatpush.xpose.msra.mxu0 %v1302_v61  ;;  %v907_v48 = vadd.f32 %v1603_v33, %v906_v8  ;;  %v1190_v9 = vmul.f32 1.442695, %v1170_v51  ;;  %v288_v37 = vxor.u32 %v272_v5, %v256_v47  ;;  %v1268_v4 = vadd.f32 %v1243_v22, %v1140_v53  ;;  %v1609_v63 = vpop.eup %1608  ;;  %v1108_v5 = vld [vmem:[#allocation8 + $0x30] sm:$0xff] }
  0xf1   :  { %v891_v18 = vmul.f32 %v1607_v25, %v890_v24  ;;  %v125_v13 = vmul.u32 128, %v86_v20  ;;  %v692_v0 = vadd.f32 2.515517, %v676_v39  ;;  %v900_v35 = vor.u32 1.1754944e-38, %v899_v45 }
  0xf2   :  { %v911_v62 = vsel %vm2558_vm3, %v1603_v33, %v907_v48  ;;  %vm1060_vm8 = vcmp.lt.f32.partialorder %v2372_v59, 0.5  ;;  %v500_v58 = vmul.f32 %v499_v10, %v2466_v49  ;;  %vm898_vm9 = vcmp.eq.f32.partialorder %v897_v43, 8.507059e+37 }
  0xf3   :  { %v916_v17 = vsel %vm2550_vm2, %v915_v6, %v911_v62  ;;  %v892_v52 = vadd.f32 %v1607_v25, %v891_v18  ;;  %v675_v15 = vmul.f32 %v659_v57, %v2503_v31  ;;  %v405_v53 = vmul.f32 0.6931472, %v1609_v63 }
  0xf4   :  { %v917_v60 = vmul.f32 %v916_v17, %v2521_v41  ;;  %v502_v41 = vsel %vm501_vm0, %v2466_v49, %v500_v58  ;;  %1612 = vpow2.f32 %v1190_v9  ;;  %v304_v21 = vshrl.u32 %v288_v37, 8 }
  0xf5   :  { %v1611_v39 = vpop.eup %1610  ;;  %v896_v42 = vsel %vm2581_vm7, %v1607_v25, %v892_v52  ;;  %vm878_vm10 = vweird.f32 %v2564_v30  ;;  %v2599_v57 = vsel %vm503_vm1, %v504_v46, %v502_v41  ;;  %v2603_v19 = vmul.f32 -2.0, %v405_v53  ;;  %v1109_v46 = vld [vmem:[#allocation8 + $0x38] sm:$0xff] }
  0xf6   :  { %v1045_v22 = vsub.f32 %v2457_v23, %v917_v60  ;;  %v141_v23 = vadd.s32 %v125_v13, %v1906_v2  ;;  %v901_v34 = vsel %vm898_vm9, %v900_v35, %v896_v42  ;;  %v874_v61 = vmul.f32 %v1611_v39, %v2564_v30 }
  0xf7   :  { %v902_v26 = vmul.f32 %v901_v34, %v692_v0  ;;  %v882_v28 = vand.u32 2147483647, %v2564_v30  ;;  %v884_v7 = vand.u32 2147483648, %v2564_v30  ;;  %v706_v6 = vmul.f32 0.001308, %v2599_v57 }
  0xf8   :  { %v1077_v36 = vsub.f32 0.0, %v1045_v22  ;;  %v875_v14 = vsub.f32 1.0, %v874_v61  ;;  %vm879_vm11 = vweird.f32 %v1611_v39  ;;  %v320_v54 = vcvt.s32.f32 %v304_v21 }
  0xf9   :  { %v1044_v8 = vsub.f32 %v2475_v44, %v902_v26  ;;  %v722_v51 = vadd.f32 0.189269, %v706_v6  ;;  %v159_v47 = vxor.u32 %v1913_v12, %v141_v23  ;;  %v1139_v38 = vmax.f32 %v2431_v50, 0.0  ;;  %vm2618_vm12 = vmor %vm878_vm10, %vm879_vm11  ;;  %v1107_v26 = vld [vmem:[#allocation8 + $0x28] sm:$0xff] }
  0xfa   :  { %v1093_v49 = vsel %vm1061_vm4, %v1077_v36, %v1045_v22  ;;  %v1613_v55 = vpop.eup %1612  ;;  %v876_v32 = vmul.f32 %v1611_v39, %v875_v14  ;;  %1614 = vrsqrt.f32 %v2603_v19  ;;  %v124_v11 = vmul.u32 128, %v1904_v1 }
  0xfb   :  { %v1285_v25 = vmul.f32 %v2516_v3, %v1093_v49  ;;  %v1076_v48 = vsub.f32 0.0, %v1044_v8  ;;  %v885_v44 = vor.u32 1.1754944e-38, %v884_v7  ;;  %v738_v3 = vmul.f32 %v722_v51, %v2599_v57 }
  0xfc   :  { %v691_v24 = vadd.f32 2.515517, %v675_v15  ;;  %v877_v43 = vadd.f32 %v1611_v39, %v876_v32  ;;  %vm883_vm13 = vcmp.eq.f32.partialorder %v882_v28, 8.507059e+37  ;;  %v336_v50 = vmul.f32 5.9604645e-08, %v320_v54 }
  0xfd   :  { %v1301_v20 = vadd.f32 %v1285_v25, %v1109_v46  ;;  %v1092_v1 = vsel %vm1060_vm8, %v1076_v48, %v1044_v8  ;;  %v1241_v62 = vmul.f32 0.6931472, %v2548_v56  ;;  %v754_v30 = vadd.f32 1.432788, %v738_v3 }
  0xfe   :  { %v175_v10 = vshrl.u32 %v159_v47, 16  ;;  %v1284_v9 = vmul.f32 %v1268_v4, %v1092_v1  ;;  %v881_v37 = vsel %vm2618_vm12, %v1611_v39, %v877_v43  ;;  %v2628_v17 = vadd.f32 2.9802322e-08, %v336_v50 }
  0xff   :  { %1317 = vst [vmem:[#allocation12 + $0x38] sm:$0xff] %v1301_v20  ;;  %1336 = vmatpush.xpose.msra.mxu0 %v1301_v20  ;;  %v140_v18 = vadd.s32 %v124_v11, %v1906_v2  ;;  %v886_v13 = vsel %vm883_vm13, %v885_v44, %v881_v37  ;;  %v642_v63 = vmul.f32 0.010328, %v2599_v57  ;;  %v770_v60 = vmul.f32 %v754_v30, %v2599_v57 }
 0x100   :  { %v191_v0 = vxor.u32 %v175_v10, %v159_v47  ;;  %v1615_v59 = vpop.eup %1614  ;;  %v1300_v33 = vadd.f32 %v1284_v9, %v1108_v5  ;;  %v887_v35 = vmul.f32 %v886_v13, %v691_v24  ;;  %v368_v56 = vsub.f32 1.0, %v2628_v17 }
 0x101   :  { %v2634_v58 = vadd.f32 1.0, %v770_v60  ;;  %v483_v4 = vmul.f32 %v1615_v59, %v2603_v19  ;;  %vm1059_vm14 = vcmp.lt.f32.partialorder %v2384_v40, 0.5  ;;  %v158_v22 = vxor.u32 %v1913_v12, %v140_v18 }
 0x102   :  { %v207_v52 = vmul.u32 2146121005, %v191_v0  ;;  %1316 = vst [vmem:[#allocation12 + $0x30] sm:$0xff] %v1300_v33  ;;  %v1043_v15 = vsub.f32 %v2503_v31, %v887_v35  ;;  %v384_v53 = vmin.f32 %v2628_v17, %v368_v56  ;;  %v1267_v41 = vadd.f32 %v1241_v62, %v1139_v38  ;;  %v2642_v31 = vld [vmem:[#allocation10 + $0x18] sm:$0xff] }
 0x103   :  { %1337 = vmatpush.xpose.msra.mxu0 %v1300_v33  ;;  %v658_v21 = vadd.f32 0.802853, %v642_v63  ;;  %1616 = vrcp.f32 %v2634_v58  ;;  %v1218_v39 = vadd.f32 1.0, %v1613_v55  ;;  %v484_v23 = vmul.f32 %v1615_v59, %v483_v4 }
 0x104   :  { %v1075_v42 = vsub.f32 0.0, %v1043_v15  ;;  %1618 = vlog2.f32 %v384_v53  ;;  %v223_v36 = vshrl.u32 %v207_v52, 15  ;;  %v174_v34 = vshrl.u32 %v158_v22, 16 }
 0x105   :  { %v485_v28 = vmul.f32 0.5, %v484_v23  ;;  %1620 = vlog2.f32 %v1218_v39  ;;  %vm489_vm15 = vcmp.eq.f32.partialorder %v2603_v19, inf  ;;  %v674_v6 = vmul.f32 %v658_v21, %v2599_v57 }
 0x106   :  { %v1091_v61 = vsel %vm1059_vm14, %v1075_v42, %v1043_v15  ;;  %v239_v40 = vxor.u32 %v223_v36, %v207_v52  ;;  %v190_v12 = vxor.u32 %v174_v34, %v158_v22  ;;  %vm491_vm0 = vcmp.eq.f32.partialorder %v2603_v19, 0.0 }
 0x107   :  { %v1283_v7 = vmul.f32 %v1267_v41, %v1091_v61  ;;  %v486_v49 = vsub.f32 1.5, %v485_v28  ;;  %v492_v25 = vand.u32 2147483648, %v2603_v19  ;;  %v1153_v8 = vand.u32 2147483647, %v2642_v31 }
 0x108   :  { %v255_v46 = vmul.u32 2221713035, %v239_v40  ;;  %v206_v51 = vmul.u32 2146121005, %v190_v12  ;;  %v867_v32 = vand.u32 2147483647, %v2634_v58  ;;  %vm863_vm1 = vweird.f32 %v2634_v58 }
 0x109   :  { %v1617_v14 = vpop.eup %1616  ;;  %v1299_v54 = vadd.f32 %v1283_v7, %v1107_v26  ;;  %v487_v38 = vmul.f32 %v1615_v59, %v486_v49  ;;  %v869_v20 = vand.u32 2147483648, %v2634_v58  ;;  %v1169_v43 = vsub.f32 0.0, %v1153_v8  ;;  %v1106_v12 = vld [vmem:[#allocation8 + $0x20] sm:$0xff] }
 0x10a   :  { %v1619_v47 = vpop.eup %1618  ;;  %v859_v55 = vmul.f32 %v1617_v14, %v2634_v58  ;;  %v271_v11 = vshrl.u32 %v255_v46, 16  ;;  %v222_v45 = vshrl.u32 %v206_v51, 15  ;;  %vm864_vm2 = vweird.f32 %v1617_v14 }
 0x10b   :  { %1315 = vst [vmem:[#allocation12 + $0x28] sm:$0xff] %v1299_v54  ;;  %1338 = vmatpush.xpose.msra.mxu0 %v1299_v54  ;;  %v403_v48 = vmul.f32 0.6931472, %v1619_v47  ;;  %v488_v3 = vmul.f32 %v487_v38, %v2603_v19  ;;  %v1621_v24 = vpop.eup %1620  ;;  %vm865_vm3 = vmor %vm863_vm1, %vm864_vm2  ;;  %v870_v10 = vor.u32 1.1754944e-38, %v869_v20  ;;  %v690_v18 = vadd.f32 2.515517, %v674_v6 }
 0x10c   :  { %v860_v44 = vsub.f32 1.0, %v859_v55  ;;  %v287_v5 = vxor.u32 %v271_v11, %v255_v46  ;;  %v238_v37 = vxor.u32 %v222_v45, %v206_v51  ;;  %vm868_vm4 = vcmp.eq.f32.partialorder %v867_v32, 8.507059e+37 }
 0x10d   :  { %v2654_v50 = vmul.f32 -2.0, %v403_v48  ;;  %v490_v62 = vsel %vm489_vm15, %v2603_v19, %v488_v3  ;;  %v1188_v60 = vmul.f32 1.442695, %v1169_v43  ;;  %v1138_v33 = vmax.f32 %v2529_v16, 0.0 }
 0x10e   :  { %v861_v1 = vmul.f32 %v1617_v14, %v860_v44  ;;  %v303_v30 = vshrl.u32 %v287_v5, 8  ;;  %v2661_v9 = vsel %vm491_vm0, %v492_v25, %v490_v62  ;;  %v1239_v58 = vmul.f32 0.6931472, %v1621_v24 }
 0x10f   :  { %1622 = vrsqrt.f32 %v2654_v50  ;;  %v705_v63 = vmul.f32 0.001308, %v2661_v9  ;;  %v254_v19 = vmul.u32 2221713035, %v238_v37  ;;  %vm1058_vm5 = vcmp.lt.f32.partialorder %v2400_v29, 0.5  ;;  %v2676_v29 = vld [vmem:[#allocation10 + $0x10] sm:$0xff] }
 0x110   :  { %v862_v13 = vadd.f32 %v1617_v14, %v861_v1  ;;  %v319_v0 = vcvt.s32.f32 %v303_v30  ;;  %1624 = vpow2.f32 %v1188_v60  ;;  %v1266_v16 = vadd.f32 %v1239_v58, %v1138_v33 }
 0x111   :  { %v721_v35 = vadd.f32 0.189269, %v705_v63  ;;  %v270_v41 = vshrl.u32 %v254_v19, 16  ;;  %v1152_v55 = vand.u32 2147483647, %v2676_v29  ;;  %vm477_vm6 = vcmp.eq.f32.partialorder %v2654_v50, inf }
 0x112   :  { %v866_v59 = vsel %vm865_vm3, %v1617_v14, %v862_v13  ;;  %v335_v4 = vmul.f32 5.9604645e-08, %v319_v0  ;;  %v641_v14 = vmul.f32 0.010328, %v2661_v9  ;;  %v480_v20 = vand.u32 2147483648, %v2654_v50 }
 0x113   :  { %v871_v56 = vsel %vm868_vm4, %v870_v10, %v866_v59  ;;  %v737_v15 = vmul.f32 %v721_v35, %v2661_v9  ;;  %v286_v36 = vxor.u32 %v270_v41, %v254_v19  ;;  %vm479_vm7 = vcmp.eq.f32.partialorder %v2654_v50, 0.0 }
 0x114   :  { %v872_v52 = vmul.f32 %v871_v56, %v690_v18  ;;  %v2667_v22 = vadd.f32 2.9802322e-08, %v335_v4  ;;  %v657_v32 = vadd.f32 0.802853, %v641_v14  ;;  %v1168_v5 = vsub.f32 0.0, %v1152_v55 }
 0x115   :  { %v1623_v53 = vpop.eup %1622  ;;  %v753_v39 = vadd.f32 1.432788, %v737_v15  ;;  %v302_v40 = vshrl.u32 %v286_v36, 8  ;;  %v1137_v41 = vmax.f32 %v2642_v31, 0.0  ;;  %vm1057_vm12 = vcmp.lt.f32.partialorder %v2480_v27, 0.5 }
 0x116   :  { %v1042_v21 = vsub.f32 %v2599_v57, %v872_v52  ;;  %v471_v42 = vmul.f32 %v1623_v53, %v2654_v50  ;;  %v367_v23 = vsub.f32 1.0, %v2667_v22  ;;  %v1625_v49 = vpop.eup %1624  ;;  %v673_v43 = vmul.f32 %v657_v32, %v2661_v9 }
 0x117   :  { %v769_v61 = vmul.f32 %v753_v39, %v2661_v9  ;;  %v318_v54 = vcvt.s32.f32 %v302_v40  ;;  %v1217_v47 = vadd.f32 1.0, %v1625_v49  ;;  %v1186_v33 = vmul.f32 1.442695, %v1168_v5 }
 0x118   :  { %v1074_v34 = vsub.f32 0.0, %v1042_v21  ;;  %v472_v26 = vmul.f32 %v1623_v53, %v471_v42  ;;  %v383_v28 = vmin.f32 %v2667_v22, %v367_v23  ;;  %v689_v56 = vadd.f32 2.515517, %v673_v43 }
 0x119   :  { %v785_v6 = vadd.f32 1.0, %v769_v61  ;;  %v334_v51 = vmul.f32 5.9604645e-08, %v318_v54  ;;  %vm1056_vm4 = vcmp.lt.f32.partialorder %v2628_v17, 0.5 }
 0x11a   :  { %v1090_v7 = vsel %vm1058_vm5, %v1074_v34, %v1042_v21  ;;  %v473_v57 = vmul.f32 0.5, %v472_v26  ;;  %1626 = vlog2.f32 %v383_v28 }
 0x11b   :  { %v1282_v46 = vmul.f32 %v1266_v16, %v1090_v7  ;;  %1628 = vrcp.f32 %v785_v6  ;;  %v2679_v11 = vadd.f32 2.9802322e-08, %v334_v51  ;;  %vm848_vm8 = vweird.f32 %v785_v6 }
 0x11c   :  { %v474_v8 = vsub.f32 1.5, %v473_v57  ;;  %1630 = vlog2.f32 %v1217_v47  ;;  %v854_v30 = vand.u32 2147483648, %v785_v6  ;;  %v852_v63 = vand.u32 2147483647, %v785_v6 }
 0x11d   :  { %v1298_v25 = vadd.f32 %v1282_v46, %v1106_v12  ;;  %v366_v44 = vsub.f32 1.0, %v2679_v11  ;;  %v1105_v46 = vld [vmem:[#allocation8 + $0x18] sm:$0xff] }
 0x11e   :  { %v475_v38 = vmul.f32 %v1623_v53, %v474_v8  ;;  %vm853_vm11 = vcmp.eq.f32.partialorder %v852_v63, 8.507059e+37 }
 0x11f   :  { %1314 = vst [vmem:[#allocation12 + $0x20] sm:$0xff] %v1298_v25  ;;  %1339 = vmatpush.xpose.msra.mxu0 %v1298_v25  ;;  %v382_v18 = vmin.f32 %v2679_v11, %v366_v44 }
 0x120   :  { %v1627_v48 = vpop.eup %1626  ;;  %v476_v45 = vmul.f32 %v475_v38, %v2654_v50 }
 0x121   :  { %v1629_v3 = vpop.eup %1628  ;;  %v401_v24 = vmul.f32 0.6931472, %v1627_v48 }
 0x122   :  { %v844_v1 = vmul.f32 %v1629_v3, %v785_v6  ;;  %v478_v62 = vsel %vm477_vm6, %v2654_v50, %v476_v45  ;;  %vm849_vm9 = vweird.f32 %v1629_v3  ;;  %v1631_v35 = vpop.eup %1630  ;;  %v855_v50 = vor.u32 1.1754944e-38, %v854_v30  ;;  %v2703_v6 = vld [vmem:[#allocation10 + $0x8] sm:$0xff] }
 0x123   :  { %v2688_v10 = vsel %vm479_vm7, %v480_v20, %v478_v62  ;;  %v2690_v37 = vmul.f32 -2.0, %v401_v24  ;;  %vm850_vm10 = vmor %vm848_vm8, %vm849_vm9  ;;  %v1237_v21 = vmul.f32 0.6931472, %v1631_v35  ;;  %v1151_v27 = vand.u32 2147483647, %v2703_v6 }
 0x124   :  { %v845_v13 = vsub.f32 1.0, %v844_v1  ;;  %v704_v60 = vmul.f32 0.001308, %v2688_v10  ;;  %v640_v12 = vmul.f32 0.010328, %v2688_v10 }
 0x125   :  { %1632 = vrsqrt.f32 %v2690_v37  ;;  %v1265_v28 = vadd.f32 %v1237_v21, %v1137_v41  ;;  %vm465_vm13 = vcmp.eq.f32.partialorder %v2690_v37, inf  ;;  %v468_v55 = vand.u32 2147483648, %v2690_v37 }
 0x126   :  { %v846_v0 = vmul.f32 %v1629_v3, %v845_v13  ;;  %v720_v59 = vadd.f32 0.189269, %v704_v60  ;;  %1634 = vlog2.f32 %v382_v18  ;;  %v656_v25 = vadd.f32 0.802853, %v640_v12 }
 0x127   :  { %1636 = vpow2.f32 %v1186_v33  ;;  %vm467_vm14 = vcmp.eq.f32.partialorder %v2690_v37, 0.0  ;;  %v1167_v45 = vsub.f32 0.0, %v1151_v27 }
 0x128   :  { %v847_v58 = vadd.f32 %v1629_v3, %v846_v0  ;;  %v736_v4 = vmul.f32 %v720_v59, %v2688_v10  ;;  %v672_v20 = vmul.f32 %v656_v25, %v2688_v10 }
 0x129   :  { %v1184_v33 = vmul.f32 1.442695, %v1167_v45 }
 0x12a   :  { %v851_v19 = vsel %vm850_vm10, %v1629_v3, %v847_v58  ;;  %v752_v52 = vadd.f32 1.432788, %v736_v4  ;;  %v688_v18 = vadd.f32 2.515517, %v672_v20  ;;  %v1136_v58 = vmax.f32 %v2676_v29, 0.0 }
 0x12b   :  { %v1633_v15 = vpop.eup %1632  ;;  %v856_v53 = vsel %vm853_vm11, %v855_v50, %v851_v19  ;;  %vm1055_vm10 = vcmp.lt.f32.partialorder %v2667_v22, 0.5 }
 0x12c   :  { %v857_v39 = vmul.f32 %v856_v53, %v689_v56  ;;  %v768_v42 = vmul.f32 %v752_v52, %v2688_v10  ;;  %v459_v16 = vmul.f32 %v1633_v15, %v2690_v37  ;;  %v1635_v23 = vpop.eup %1634  ;;  %v2723_v52 = vld [vmem:[#allocation10] sm:$0xff] }
 0x12d   :  { %v399_v26 = vmul.f32 0.6931472, %v1635_v23  ;;  %v1637_v40 = vpop.eup %1636 }
 0x12e   :  { %v1041_v36 = vsub.f32 %v2661_v9, %v857_v39  ;;  %v784_v34 = vadd.f32 1.0, %v768_v42  ;;  %v460_v61 = vmul.f32 %v1633_v15, %v459_v16  ;;  %v1216_v9 = vadd.f32 1.0, %v1637_v40 }
 0x12f   :  { %v2705_v57 = vmul.f32 -2.0, %v399_v26  ;;  %v1150_v42 = vand.u32 2147483647, %v2723_v52 }
 0x130   :  { %v1073_v7 = vsub.f32 0.0, %v1041_v36  ;;  %1638 = vrcp.f32 %v784_v34  ;;  %v461_v31 = vmul.f32 0.5, %v460_v61  ;;  %vm833_vm15 = vweird.f32 %v784_v34 }
 0x131   :  { %1640 = vrsqrt.f32 %v2705_v57  ;;  %v839_v48 = vand.u32 2147483648, %v784_v34  ;;  %v837_v5 = vand.u32 2147483647, %v784_v34  ;;  %vm453_vm3 = vcmp.eq.f32.partialorder %v2705_v57, inf }
 0x132   :  { %v1089_v49 = vsel %vm1057_vm12, %v1073_v7, %v1041_v36  ;;  %v462_v54 = vsub.f32 1.5, %v461_v31  ;;  %1642 = vlog2.f32 %v1216_v9  ;;  %v456_v23 = vand.u32 2147483648, %v2705_v57 }
 0x133   :  { %v1281_v14 = vmul.f32 %v1265_v28, %v1089_v49  ;;  %v840_v13 = vor.u32 1.1754944e-38, %v839_v48  ;;  %vm838_vm2 = vcmp.eq.f32.partialorder %v837_v5, 8.507059e+37  ;;  %1644 = vpow2.f32 %v1184_v33  ;;  %v1104_v28 = vld [vmem:[#allocation8 + $0x10] sm:$0xff] }
 0x134   :  { %v463_v51 = vmul.f32 %v1633_v15, %v462_v54  ;;  %vm455_vm5 = vcmp.eq.f32.partialorder %v2705_v57, 0.0  ;;  %v1166_v7 = vsub.f32 0.0, %v1150_v42 }
 0x135   :  { %v1297_v8 = vadd.f32 %v1281_v14, %v1105_v46 }
 0x136   :  { %v1639_v47 = vpop.eup %1638  ;;  %v464_v38 = vmul.f32 %v463_v51, %v2690_v37  ;;  %v1182_v54 = vmul.f32 1.442695, %v1166_v7 }
 0x137   :  { %1313 = vst [vmem:[#allocation12 + $0x18] sm:$0xff] %v1297_v8  ;;  %1340 = vmatpush.xpose.msra.mxu0 %v1297_v8  ;;  %v829_v32 = vmul.f32 %v1639_v47, %v784_v34  ;;  %v1641_v44 = vpop.eup %1640  ;;  %vm834_vm0 = vweird.f32 %v1639_v47 }
 0x138   :  { %v466_v24 = vsel %vm465_vm13, %v2690_v37, %v464_v38  ;;  %v447_v1 = vmul.f32 %v1641_v44, %v2705_v57  ;;  %vm835_vm1 = vmor %vm833_vm15, %vm834_vm0  ;;  %v1643_v60 = vpop.eup %1642  ;;  %vm1054_vm15 = vcmp.lt.f32.partialorder %v2679_v11, 0.5 }
 0x139   :  { %v830_v3 = vsub.f32 1.0, %v829_v32  ;;  %v2717_v43 = vsel %vm467_vm14, %v468_v55, %v466_v24  ;;  %v1235_v4 = vmul.f32 0.6931472, %v1643_v60 }
 0x13a   :  { %v703_v30 = vmul.f32 0.001308, %v2717_v43  ;;  %v448_v63 = vmul.f32 %v1641_v44, %v447_v1  ;;  %v639_v40 = vmul.f32 0.010328, %v2717_v43 }
 0x13b   :  { %v831_v62 = vmul.f32 %v1639_v47, %v830_v3  ;;  %v1264_v16 = vadd.f32 %v1235_v4, %v1136_v58 }
 0x13c   :  { %v719_v59 = vadd.f32 0.189269, %v703_v30  ;;  %v449_v35 = vmul.f32 0.5, %v448_v63  ;;  %v655_v14 = vadd.f32 0.802853, %v639_v40 }
 0x13d   :  { %v832_v0 = vadd.f32 %v1639_v47, %v831_v62 }
 0x13e   :  { %v735_v37 = vmul.f32 %v719_v59, %v2717_v43  ;;  %v450_v19 = vsub.f32 1.5, %v449_v35  ;;  %v671_v8 = vmul.f32 %v655_v14, %v2717_v43 }
 0x13f   :  { %v836_v50 = vsel %vm835_vm1, %v1639_v47, %v832_v0 }
 0x140   :  { %v841_v56 = vsel %vm838_vm2, %v840_v13, %v836_v50  ;;  %v751_v53 = vadd.f32 1.432788, %v735_v37  ;;  %v451_v41 = vmul.f32 %v1641_v44, %v450_v19  ;;  %v687_v3 = vadd.f32 2.515517, %v671_v8  ;;  %v1103_v19 = vld [vmem:[#allocation8 + $0x8] sm:$0xff] }
 0x141   :  { %v842_v15 = vmul.f32 %v841_v56, %v688_v18  ;;  %v1135_v18 = vmax.f32 %v2703_v6, 0.0 }
 0x142   :  { %v767_v39 = vmul.f32 %v751_v53, %v2717_v43  ;;  %v452_v29 = vmul.f32 %v451_v41, %v2705_v57 }
 0x143   :  { %v1040_v21 = vsub.f32 %v2688_v10, %v842_v15  ;;  %v1645_v10 = vpop.eup %1644 }
 0x144   :  { %v783_v34 = vadd.f32 1.0, %v767_v39  ;;  %v454_v61 = vsel %vm453_vm3, %v2705_v57, %v452_v29  ;;  %v1215_v46 = vadd.f32 1.0, %v1645_v10 }
 0x145   :  { %v1072_v36 = vsub.f32 0.0, %v1040_v21  ;;  %v2735_v17 = vsel %vm455_vm5, %v456_v23, %v454_v61  ;;  %v1134_v23 = vmax.f32 %v2723_v52, 0.0  ;;  %v1327_v52 = vld [vmem:[#allocation5] sm:$0xff] }
 0x146   :  { %1646 = vrcp.f32 %v783_v34  ;;  %v702_v31 = vmul.f32 0.001308, %v2735_v17  ;;  %v824_v51 = vand.u32 2147483648, %v783_v34  ;;  %vm818_vm6 = vweird.f32 %v783_v34 }
 0x147   :  { %v1088_v26 = vsel %vm1056_vm4, %v1072_v36, %v1040_v21  ;;  %1648 = vlog2.f32 %v1215_v46  ;;  %v822_v32 = vand.u32 2147483647, %v783_v34  ;;  %v638_v1 = vmul.f32 0.010328, %v2735_v17 }
 0x148   :  { %v1280_v12 = vmul.f32 %v1264_v16, %v1088_v26  ;;  %v718_v9 = vadd.f32 0.189269, %v702_v31  ;;  %1650 = vpow2.f32 %v1182_v54  ;;  %v825_v48 = vor.u32 1.1754944e-38, %v824_v51 }
 0x149   :  { %vm823_vm9 = vcmp.eq.f32.partialorder %v822_v32, 8.507059e+37  ;;  %v654_v0 = vadd.f32 0.802853, %v638_v1  ;;  %v1356_v26 = vstv %s1486_s3 }
 0x14a   :  { %v1296_v49 = vadd.f32 %v1280_v12, %v1104_v28  ;;  %v734_v25 = vmul.f32 %v718_v9, %v2735_v17  ;;  %v1357_v40 = vxor.u32 %v1356_v26, %v1906_v2  ;;  %v1102_v12 = vld [vmem:[#allocation8] sm:$0xff] }
 0x14b   :  { %v670_v56 = vmul.f32 %v654_v0, %v2735_v17 }
 0x14c   :  { %1312 = vst [vmem:[#allocation12 + $0x10] sm:$0xff] %v1296_v49  ;;  %1341 = vmatpush.xpose.msra.mxu0 %v1296_v49  ;;  %v1647_v57 = vpop.eup %1646  ;;  %v750_v47 = vadd.f32 1.432788, %v734_v25  ;;  %v1358_v31 = vshrl.u32 %v1357_v40, 16 }
 0x14d   :  { %v814_v27 = vmul.f32 %v1647_v57, %v783_v34  ;;  %vm819_vm7 = vweird.f32 %v1647_v57  ;;  %v1649_v44 = vpop.eup %1648  ;;  %v686_v39 = vadd.f32 2.515517, %v670_v56 }
 0x14e   :  { %v766_v38 = vmul.f32 %v750_v47, %v2735_v17  ;;  %vm820_vm8 = vmor %vm818_vm6, %vm819_vm7  ;;  %v1651_v24 = vpop.eup %1650  ;;  %v1233_v13 = vmul.f32 0.6931472, %v1649_v44  ;;  %v1359_v46 = vxor.u32 %v1358_v31, %v1357_v40  ;;  %v1353_v31 = vld [vmem:[%s2777_s4] sm:$0x1] }
 0x14f   :  { %v815_v55 = vsub.f32 1.0, %v814_v27  ;;  %v1214_v60 = vadd.f32 1.0, %v1651_v24 }
 0x150   :  { %v782_v45 = vadd.f32 1.0, %v766_v38  ;;  %v1263_v35 = vadd.f32 %v1233_v13, %v1135_v18  ;;  %v1360_v9 = vmul.u32 2146121005, %v1359_v46 }
 0x151   :  { %v816_v20 = vmul.f32 %v1647_v57, %v815_v55 }
 0x152   :  { %1652 = vrcp.f32 %v782_v45  ;;  %vm803_vm11 = vweird.f32 %v782_v45  ;;  %v809_v58 = vand.u32 2147483648, %v782_v45  ;;  %v807_v15 = vand.u32 2147483647, %v782_v45 }
 0x153   :  { %v817_v5 = vadd.f32 %v1647_v57, %v816_v20  ;;  %1654 = vlog2.f32 %v1214_v60  ;;  %v1361_v54 = vshrl.u32 %v1360_v9, 15 }
 0x154   :  { %vm808_vm14 = vcmp.eq.f32.partialorder %v807_v15, 8.507059e+37 }
 0x155   :  { %v821_v62 = vsel %vm820_vm8, %v1647_v57, %v817_v5  ;;  %v1362_v2 = vxor.u32 %v1361_v54, %v1360_v9 }
 0x156   :  { %v826_v30 = vsel %vm823_vm9, %v825_v48, %v821_v62 }
 0x157   :  { %v827_v63 = vmul.f32 %v826_v30, %v687_v3  ;;  %v1363_v11 = vmul.u32 2221713035, %v1362_v2 }
 0x158   :  { %v1653_v33 = vpop.eup %1652 }
 0x159   :  { %v1039_v59 = vsub.f32 %v2717_v43, %v827_v63  ;;  %v799_v37 = vmul.f32 %v1653_v33, %v782_v45  ;;  %vm804_vm12 = vweird.f32 %v1653_v33  ;;  %v810_v43 = vor.u32 1.1754944e-38, %v809_v58  ;;  %v1655_v22 = vpop.eup %1654 }
 0x15a   :  { %vm805_vm13 = vmor %vm803_vm11, %vm804_vm12  ;;  %v1231_v36 = vmul.f32 0.6931472, %v1655_v22 }
 0x15b   :  { %v1071_v50 = vsub.f32 0.0, %v1039_v59  ;;  %v800_v6 = vsub.f32 1.0, %v799_v37 }
 0x15c   :  { %v1262_v10 = vadd.f32 %v1231_v36, %v1134_v23 }
 0x15d   :  { %v1087_v4 = vsel %vm1055_vm10, %v1071_v50, %v1039_v59  ;;  %v801_v41 = vmul.f32 %v1653_v33, %v800_v6 }
 0x15e   :  { %v1279_v53 = vmul.f32 %v1263_v35, %v1087_v4 }
 0x15f   :  { %v802_v42 = vadd.f32 %v1653_v33, %v801_v41 }
 0x160   :  { %v1295_v21 = vadd.f32 %v1279_v53, %v1103_v19 }
 0x161   :  { %v806_v16 = vsel %vm805_vm13, %v1653_v33, %v802_v42  ;;  %v1416_v33 = vld [vmem:[%s2778_s5] sm:$0x1]  ;;  %s1839_s5 = smov [#allocation14]  }
 0x162   :  { %1311 = vst [vmem:[#allocation12 + $0x8] sm:$0xff] %v1295_v21  ;;  %1342 = vmatpush.xpose.msra.mxu0 %v1295_v21  ;;  %v811_v29 = vsel %vm808_vm14, %v810_v43, %v806_v16  ;;  %v1418_v50 = vand.u32 2147483647, %v1416_v33  ;;  %v1417_v26 = vmax.f32 %v1416_v33, 0.0  ;;  %s1464_s30 = sshll.u32 %s1839_s5, 4  ;;  %s1465_s30 = int_to_ptr.vmem [resolvable:$true] %s1464_s30 }
 0x163   :  { %v812_v34 = vmul.f32 %v811_v29, %v686_v39 }
 0x164   :  { %v1419_v37 = vsub.f32 0.0, %v1418_v50 }
 0x165   :  { %v1038_v61 = vsub.f32 %v2735_v17, %v812_v34  ;;  %v1364_v17 = vshrl.u32 %v1363_v11, 16 }
 0x166   :  { %v1420_v56 = vmul.f32 1.442695, %v1419_v37 }
 0x167   :  { %v1070_v28 = vsub.f32 0.0, %v1038_v61  ;;  %v1365_v57 = vxor.u32 %v1364_v17, %v1363_v11 }
 0x169   :  { %v1086_v7 = vsel %vm1054_vm15, %v1070_v28, %v1038_v61  ;;  %v1366_v25 = vshrl.u32 %v1365_v57, 8 }
 0x16a   :  { %v1278_v49 = vmul.f32 %v1262_v10, %v1086_v7 }
 0x16b   :  { %v1367_v27 = vcvt.s32.f32 %v1366_v25 }
 0x16c   :  { %v1294_v14 = vadd.f32 %v1278_v49, %v1102_v12 }
 0x16d   :  { %v1368_v8 = vmul.f32 5.9604645e-08, %v1367_v27 }
 0x16e   :  { %1310 = vst [vmem:[#allocation12] sm:$0xff] %v1294_v14  ;;  %1343 = vmatpush.xpose.msra.mxu0 %v1294_v14 }
 0x16f   :  { %1458 = dma.vmem_to_hbm [thread:$0]  %s1451_s25, 2048, %s1453_s28, [#allocation13], %s1834_s16, %s1834_s16, %s1835_s17   ;;  %v2756_v51 = vadd.f32 2.9802322e-08, %v1368_v8 }
 0x170   :  { %s1442_s17 = sshll.u32 %s2779_s6, 4  ;;  %s1443_s17 = int_to_ptr.hbm [resolvable:$true] %s1442_s17 }
 0x171   :  { %1344 = vmatmul.f32.vlgmr.msra.gmra.mxu0 %v1327_v52  ;;  %v1370_v47 = vsub.f32 1.0, %v2756_v51  ;;  %vm1413_vm6 = vcmp.lt.f32.partialorder %v2756_v51, 0.5 }
 0x173   :  { %v1371_v55 = vmin.f32 %v2756_v51, %v1370_v47 }
 0x175   :  { %1656 = vlog2.f32 %v1371_v55 }
 0x17b   :  { %v1657_v32 = vpop.eup %1656 }
 0x17c   :  { %v1373_v38 = vmul.f32 0.6931472, %v1657_v32 }
 0x17e   :  { %v1374_v20 = vmul.f32 -2.0, %v1373_v38 }
 0x180   :  { %1658 = vrsqrt.f32 %v1374_v20  ;;  %vm1382_vm0 = vcmp.eq.f32.partialorder %v1374_v20, inf  ;;  %v1385_v62 = vand.u32 2147483648, %v1374_v20  ;;  %vm1384_vm1 = vcmp.eq.f32.partialorder %v1374_v20, 0.0 }
 0x186   :  { %v1659_v48 = vpop.eup %1658 }
 0x187   :  { %v1376_v45 = vmul.f32 %v1659_v48, %v1374_v20 }
 0x189   :  { %v1377_v44 = vmul.f32 %v1659_v48, %v1376_v45 }
 0x18b   :  { %v1378_v3 = vmul.f32 0.5, %v1377_v44 }
 0x18d   :  { %v1379_v5 = vsub.f32 1.5, %v1378_v3 }
 0x18f   :  { %v1380_v24 = vmul.f32 %v1659_v48, %v1379_v5 }
 0x191   :  { %v1381_v1 = vmul.f32 %v1380_v24, %v1374_v20 }
 0x193   :  { %v1383_v30 = vsel %vm1382_vm0, %v1374_v20, %v1381_v1 }
 0x194   :  { %v1386_v18 = vsel %vm1384_vm1, %v1385_v62, %v1383_v30 }
 0x195   :  { %v1391_v13 = vmul.f32 0.001308, %v1386_v18  ;;  %v1387_v19 = vmul.f32 0.010328, %v1386_v18 }
 0x197   :  { %v1392_v63 = vadd.f32 0.189269, %v1391_v13  ;;  %v1388_v53 = vadd.f32 0.802853, %v1387_v19 }
 0x199   :  { %v1393_v60 = vmul.f32 %v1392_v63, %v1386_v18  ;;  %v1389_v22 = vmul.f32 %v1388_v53, %v1386_v18 }
 0x19b   :  { %v1394_v0 = vadd.f32 1.432788, %v1393_v60  ;;  %v1390_v29 = vadd.f32 2.515517, %v1389_v22 }
 0x19d   :  { %v1395_v59 = vmul.f32 %v1394_v0, %v1386_v18 }
 0x19f   :  { %v1396_v35 = vadd.f32 1.0, %v1395_v59 }
 0x1a1   :  { %1660 = vrcp.f32 %v1396_v35  ;;  %v1408_v43 = vand.u32 2147483648, %v1396_v35  ;;  %vm1402_vm2 = vweird.f32 %v1396_v35  ;;  %v1406_v42 = vand.u32 2147483647, %v1396_v35 }
 0x1a2   :  { %1662 = vpow2.f32 %v1420_v56 }
 0x1a3   :  { %v1409_v16 = vor.u32 1.1754944e-38, %v1408_v43  ;;  %vm1407_vm5 = vcmp.eq.f32.partialorder %v1406_v42, 8.507059e+37 }
 0x1a7   :  { %v1661_v58 = vpop.eup %1660 }
 0x1a8   :  { %v1398_v4 = vmul.f32 %v1661_v58, %v1396_v35  ;;  %v1663_v15 = vpop.eup %1662  ;;  %vm1403_vm3 = vweird.f32 %v1661_v58 }
 0x1a9   :  { %v1422_v21 = vadd.f32 1.0, %v1663_v15  ;;  %vm1404_vm4 = vmor %vm1402_vm2, %vm1403_vm3 }
 0x1aa   :  { %v1399_v6 = vsub.f32 1.0, %v1398_v4 }
 0x1ab   :  { %1664 = vlog2.f32 %v1422_v21 }
 0x1ac   :  { %v1400_v41 = vmul.f32 %v1661_v58, %v1399_v6 }
 0x1ae   :  { %v1401_v39 = vadd.f32 %v1661_v58, %v1400_v41 }
 0x1b0   :  { %v1405_v23 = vsel %vm1404_vm4, %v1661_v58, %v1401_v39 }
 0x1b1   :  { %v1410_v36 = vsel %vm1407_vm5, %v1409_v16, %v1405_v23  ;;  %v1665_v61 = vpop.eup %1664 }
 0x1b2   :  { %v1411_v34 = vmul.f32 %v1410_v36, %v1390_v29  ;;  %v1424_v28 = vmul.f32 0.6931472, %v1665_v61 }
 0x1b4   :  { %v1412_v10 = vsub.f32 %v1386_v18, %v1411_v34  ;;  %v1425_v7 = vadd.f32 %v1424_v28, %v1417_v26 }
 0x1b6   :  { %v1414_v40 = vsub.f32 0.0, %v1412_v10 }
 0x1b8   :  { %v1415_v12 = vsel %vm1413_vm6, %v1414_v40, %v1412_v10 }
 0x1b9   :  { %v1426_v49 = vmul.f32 %v1425_v7, %v1415_v12 }
 0x1bb   :  { %v1427_v46 = vadd.f32 %v1426_v49, %v1353_v31 }
 0x1bd   :  { %1428 = vst [vmem:[#allocation14] sm:$0x1] %v1427_v46  ;;  %v1431_v14 = vperm.slane %v1427_v46, 0 }
 0x1be   :  { %1469 = dma.vmem_to_hbm [thread:$0]  %s1465_s30, 16, %s1467_s11, [#allocation13]  }
 0x1ee   :  { %v1345_v9 = vpop.f32.mrf.mxu0 }
 0x1ef   :  { %v1433_v52 = vadd.f32 %v1431_v14, %v1345_v9 }
 0x1f1   :  { %1434 = vst [vmem:[#allocation11] sm:$0xff] %v1433_v52 }
 0x1f2   :  { %1445 = dma.vmem_to_hbm [thread:$0]  %s1441_s0, 128, %s1443_s17, [#allocation7]  }
 0x1f3   :  { %1828 = dma.done.wait [#allocation7], 128  }
 0x1f4   :  { %1829 = vsyncadd [#allocation7], 4294967168 }
 0x1f5   :  { %1830 = dma.done.wait [#allocation13], 2064  }
 0x1f6   :  { %1831 = vsyncadd [#allocation13], 4294965232 }
 0x1f7   :  { %1482 = vsyncpa [#allocation6], 1 }
 0x1f8   :  { %1483 = vsyncpa [#allocation9], 1 }
 0x1f9   :  { %1484 = vsyncpa [#allocation7], 1 }
 0x1fa   :  { %1485 = vsyncpa [#allocation13], 1 }

</bundles_post_ra>
